<compile_context>
chip_gen: v6e
topology: v6e:2x2x1
jax: 0.10.0
libtpu: 0.0.40
codegen_flags: <defaults>
</compile_context>

<pallas_src>
import functools

import jax
import jax.numpy as jnp
from jax import lax
from jax.experimental import pallas as pl
from jax.experimental.pallas import tpu as pltpu

EPS = 1e-5  # LayerNorm eps (VITS-style channel LayerNorm)


def _layer_norm(h, gamma, beta):
    # channel LayerNorm (normalizes last axis = channels), f32
    mean = jnp.mean(h, axis=-1, keepdims=True)
    var = jnp.mean(jnp.square(h - mean), axis=-1, keepdims=True)
    return (h - mean) * lax.rsqrt(var + EPS) * gamma + beta


# ----------------------------------------------------------------------------
# Fused kernel: one program per batch element, everything resident in VMEM.
# ----------------------------------------------------------------------------
def fused_pitch_kernel(
        # per-batch inputs
        x_ref, mcol_ref, sp_ref,
        # shared parameters
        pre_w_ref, pre_b_ref,
        cw_ref, cb_ref, cg_ref, cbeta_ref,
        wq_ref, bq_ref, wk_ref, bk_ref, wv_ref, bv_ref, wo_ref, bo_ref,
        ng_ref, nb_ref,
        pw_ref, pb_ref, pew_ref, peb_ref,
        # outputs
        pitch_ref, emb_ref,
        *, n_stack, n_blocks_per_stack, num_heads, kernel_size,
        use_pre_attention):
    f32, bf16 = jnp.float32, jnp.bfloat16
    T, C = x_ref.shape[1], x_ref.shape[2]
    K = kernel_size
    pad = K // 2
    H = num_heads
    D = C // H
    scale = 1.0 / float(D) ** 0.5

    x0 = x_ref[0].astype(f32)              # [T, C], resident for the whole pipeline
    mask_col = mcol_ref[0].astype(f32)     # [T, 1]
    sp = sp_ref[0]                         # [S, Ccond]

    # --- pre-attention 1x1 conv on the speech prompt (done once) ------------
    if use_pre_attention:
        sp = jnp.dot(sp.astype(bf16), pre_w_ref[...],
                     preferred_element_type=f32) + pre_b_ref[...]
    sp_b = sp.astype(bf16)                 # [S, C]

    ng, nb = ng_ref[...], nb_ref[...]

    # --- hoisted per-head K / V (prompt & attention weights are invariant ----
    #     across stacks; reference reuses one attention module).
    kh, vh = [], []
    for h in range(H):
        kh.append((jnp.dot(sp_b, wk_ref[h], preferred_element_type=f32)
                   + bk_ref[h]).astype(bf16))            # [S, D]
        vh.append((jnp.dot(sp_b, wv_ref[h], preferred_element_type=f32)
                   + bv_ref[h]).astype(bf16))            # [S, D]

    def shifted(a, s):
        # tap[t] = a[t + s] with zero fill outside [0, T): pure sublane shift
        # in the value domain (no VMEM pad-scratch round trip, no lane concat).
        if s == 0:
            return a
        z = jnp.zeros((abs(s), a.shape[1]), a.dtype)
        if s > 0:
            return jnp.concatenate([a[s:, :], z], axis=0)
        return jnp.concatenate([z, a[:T + s, :]], axis=0)

    def conv1d_taps(xm, w_ref, base, bias):
        # Conv1d(*, K, 'same') as K accumulated matmuls (bf16 operands, f32 acc).
        acc = jnp.dot(shifted(xm, -pad).astype(bf16), w_ref[base],
                      preferred_element_type=f32)
        for k in range(1, K):
            acc += jnp.dot(shifted(xm, k - pad).astype(bf16), w_ref[base + k],
                           preferred_element_type=f32)
        return acc + bias

    def conv_block(blk, h_in):
        # x = Dropout(ReLU(LayerNorm(Conv1d(x * mask)))) + x   (Dropout = identity)
        h = conv1d_taps(h_in * mask_col, cw_ref, blk * K, cb_ref[blk])
        h = jnp.maximum(_layer_norm(h, cg_ref[blk], cbeta_ref[blk]), 0.0)
        return h + h_in

    def attention_update(h_in):
        # x = LayerNorm(MHA(x, prompt) + x); Wo folded into the head loop,
        # no head concat, no separate [T,C]x[C,C] projection.
        # (No prompt mask -- the reference passes none.)
        # TODO(synk): tile S with an online softmax for very long prompts.
        x_b = h_in.astype(bf16)
        o = jnp.zeros((T, C), f32)
        for h in range(H):
            q = ((jnp.dot(x_b, wq_ref[h], preferred_element_type=f32)
                  + bq_ref[h]) * scale).astype(bf16)                 # [T, D]
            s = lax.dot_general(q, kh[h], (((1,), (1,)), ((), ())),
                                preferred_element_type=f32)          # [T, S]
            s = s - jnp.max(s, axis=-1, keepdims=True)
            p = jnp.exp(s)
            # exact reciprocal (EUP); switch to approx=True for max perf.
            p = p * pl.reciprocal(jnp.sum(p, axis=-1, keepdims=True))
            pv = jnp.dot(p.astype(bf16), vh[h],
                         preferred_element_type=f32)                 # [T, D]
            o += jnp.dot(pv.astype(bf16), wo_ref[h],
                         preferred_element_type=f32)                 # [T, C]
        return _layer_norm(o + bo_ref[...] + h_in, ng, nb)

    def stack_body(si, h_in):
        h1 = lax.fori_loop(
            0, n_blocks_per_stack,
            lambda j, hh: conv_block(si * n_blocks_per_stack + j, hh),
            h_in)
        return attention_update(h1)

    x_fin = lax.fori_loop(0, n_stack, stack_body, x0)

    # --- final Conv1d(C->1, K, 'same'): computed ONCE, feeds both the pitch
    #     output and the pitch embedding (bit-identical).
    pitch = conv1d_taps(x_fin * mask_col, pw_ref, 0, pb_ref[...]) * mask_col  # [T, 1]
    pitch_ref[0] = pitch.astype(pitch_ref.dtype)

    # --- pitch embedding: Conv1d(1->C, 1x1) + shared LayerNorm, masked -------
    emb = pitch * pew_ref[...] + peb_ref[...]                                 # [T, C]
    emb_ref[0] = (_layer_norm(emb, ng, nb) * mask_col).astype(emb_ref.dtype)


# ----------------------------------------------------------------------------
# BlockSpec helpers + wrapper
# ----------------------------------------------------------------------------
def _batch_spec(shape):
    nd = len(shape)
    return pl.BlockSpec((1,) + tuple(shape[1:]), lambda b: (b,) + (0,) * (nd - 1))


def _full_spec(shape):
    nd = len(shape)
    return pl.BlockSpec(tuple(shape), lambda b: (0,) * nd)


def _vmem_limit_bytes():
    # ~3/4 of physical VMEM: ~96 MB on v5e/v6e (128 MiB parts), ~48 MB on v7x.
    try:
        cap = pltpu.get_tpu_info().vmem_capacity_bytes
    except Exception:
        cap = 64 * 1024 * 1024
    return int(min(100 * 1024 * 1024, max(32 * 1024 * 1024, cap * 3 // 4)))


def pitch_predictor_forward(x, masks, speech_prompts, params,
                            out_dtype=jnp.float32):
    """x: [B, T, C], masks: [B, T, 1], speech_prompts: [B, S, Ccond].
    Returns (pitches [B, T], pitch_embed [B, T, C]).
    out_dtype can be set to bf16 to halve the HBM writeback if downstream
    consumers accept it."""
    B, T, C = x.shape

    kernel = functools.partial(
        fused_pitch_kernel,
        n_stack=params["n_stack"],
        n_blocks_per_stack=params["n_stack_in_stack"],
        num_heads=params["num_heads"],
        kernel_size=params["kernel_size"],
        use_pre_attention=params["use_pre_attention"],
    )

    batch_args = [x, masks, speech_prompts]
    shared_keys = ("pre_w", "pre_b",
                   "conv_w", "conv_b", "conv_g", "conv_beta",
                   "wq", "bq", "wk", "bk", "wv", "bv", "wo", "bo",
                   "norm_g", "norm_b",
                   "proj_w", "proj_b",
                   "pe_w", "pe_b")
    shared_args = [params[k] for k in shared_keys]

    pitch_col, pitch_embed = pl.pallas_call(
        kernel,
        out_shape=(jax.ShapeDtypeStruct((B, T, 1), out_dtype),
                   jax.ShapeDtypeStruct((B, T, C), out_dtype)),
        grid=(B,),
        in_specs=([_batch_spec(a.shape) for a in batch_args]
                  + [_full_spec(a.shape) for a in shared_args]),
        out_specs=(pl.BlockSpec((1, T, 1), lambda b: (b, 0, 0)),
                   pl.BlockSpec((1, T, C), lambda b: (b, 0, 0))),
        compiler_params=pltpu.CompilerParams(
            dimension_semantics=("parallel",),      # one TC per batch element
            vmem_limit_bytes=_vmem_limit_bytes()),
    )(*batch_args, *shared_args)

    pitches = pitch_col[:, :, 0]        # [B, T]  (torch squeeze(1)); free squeeze
    return pitches, pitch_embed


# ----------------------------------------------------------------------------
# Deterministic parameter init (synthetic; shapes from the module __init__)
# ----------------------------------------------------------------------------
def init_params(key, channels, condition_channels, kernel_size,
                n_stack, n_stack_in_stack, num_heads):
    C, Cc, K, H = channels, condition_channels, kernel_size, num_heads
    D = C // H
    NB = n_stack * n_stack_in_stack
    keys = iter(jax.random.split(key, 32))
    bf16 = jnp.bfloat16

    def nrm(shape, scale=0.1):
        return scale * jax.random.normal(next(keys), shape, jnp.float32)

    def split_heads_w(w):    # [C_in, C] -> [H, C_in, D] (per-head output cols)
        return jnp.transpose(w.reshape(w.shape[0], H, D), (1, 0, 2))

    def split_heads_b(b):    # [1, C] -> [H, 1, D]
        return jnp.transpose(b.reshape(1, H, D), (1, 0, 2))

    return dict(
        kernel_size=K, num_heads=H,
        n_stack=n_stack, n_stack_in_stack=n_stack_in_stack,
        use_pre_attention=(C != Cc),
        # pre-attention 1x1 conv (condition_channels -> channels)
        pre_w=nrm((Cc, C)).astype(bf16), pre_b=nrm((1, C)),
        # stacked conv-block params; conv weights flattened to [NB*K, C, C]
        # so the kernel indexes them dynamically as conv_w[block*K + tap]
        conv_w=nrm((NB * K, C, C)).astype(bf16),
        conv_b=nrm((NB, 1, C)),
        conv_g=jnp.ones((NB, 1, C), jnp.float32),
        conv_beta=jnp.zeros((NB, 1, C), jnp.float32),
        # cross attention (single module reused across stacks, like torch);
        # Q/K/V weights pre-split per head, Wo pre-split by its input rows
        wq=split_heads_w(nrm((C, C))).astype(bf16), bq=split_heads_b(nrm((1, C))),
        wk=split_heads_w(nrm((C, C))).astype(bf16), bk=split_heads_b(nrm((1, C))),
        wv=split_heads_w(nrm((C, C))).astype(bf16), bv=split_heads_b(nrm((1, C))),
        wo=nrm((C, C)).reshape(H, D, C).astype(bf16), bo=nrm((1, C)),
        # self.norm (shared by the stack-output LN and the pitch-embedding LN)
        norm_g=jnp.ones((1, C), jnp.float32),
        norm_b=jnp.zeros((1, C), jnp.float32),
        # projection Conv1d(C, 1, K) as K taps of [C, 1]
        proj_w=nrm((K, C, 1)).astype(bf16),
        proj_b=nrm((1, 1)),
        # pitch embedding Conv1d(1, C, 1)
        pe_w=nrm((1, C)), pe_b=nrm((1, C)),
    )


# ----------------------------------------------------------------------------
if __name__ == "__main__":
    B, C, Cc, T, S = 2, 32, 16, 16, 8
    K, n_stack, n_sis, heads = 3, 2, 2, 2

    key = jax.random.PRNGKey(0)
    kx, ksp, kp = jax.random.split(key, 3)
    x = jax.random.normal(kx, (B, T, C), jnp.float32)            # torch: [B, C, T]
    speech_prompts = jax.random.normal(ksp, (B, S, Cc), jnp.float32)
    lengths = jnp.array([T, T - 4])
    masks = (jnp.arange(T)[None, :] < lengths[:, None]
             ).astype(jnp.float32)[..., None]                    # [B, T, 1]

    params = init_params(kp, C, Cc, K, n_stack, n_sis, heads)

    pitches, pitch_embed = pitch_predictor_forward(x, masks, speech_prompts, params)
    jax.block_until_ready((pitches, pitch_embed))

    assert pitches.shape == (B, T)
    assert pitch_embed.shape == (B, T, C)
    assert bool(jnp.all(jnp.isfinite(pitches)))
    assert bool(jnp.all(jnp.isfinite(pitch_embed)))
    print("KERNEL_OK")
</pallas_src>

<mosaic_0001>
module attributes {stable_mosaic.version = 11 : i64} {
  func.func @fused_pitch_kernel(%arg0: i32, %arg1: memref<1x16x32xf32, #tpu.memory_space<vmem>>, %arg2: memref<1x16x1xf32, #tpu.memory_space<vmem>>, %arg3: memref<1x8x16xf32, #tpu.memory_space<vmem>>, %arg4: memref<16x32xbf16, #tpu.memory_space<vmem>>, %arg5: memref<1x32xf32, #tpu.memory_space<vmem>>, %arg6: memref<12x32x32xbf16, #tpu.memory_space<vmem>>, %arg7: memref<4x1x32xf32, #tpu.memory_space<vmem>>, %arg8: memref<4x1x32xf32, #tpu.memory_space<vmem>>, %arg9: memref<4x1x32xf32, #tpu.memory_space<vmem>>, %arg10: memref<2x32x16xbf16, #tpu.memory_space<vmem>>, %arg11: memref<2x1x16xf32, #tpu.memory_space<vmem>>, %arg12: memref<2x32x16xbf16, #tpu.memory_space<vmem>>, %arg13: memref<2x1x16xf32, #tpu.memory_space<vmem>>, %arg14: memref<2x32x16xbf16, #tpu.memory_space<vmem>>, %arg15: memref<2x1x16xf32, #tpu.memory_space<vmem>>, %arg16: memref<2x16x32xbf16, #tpu.memory_space<vmem>>, %arg17: memref<1x32xf32, #tpu.memory_space<vmem>>, %arg18: memref<1x32xf32, #tpu.memory_space<vmem>>, %arg19: memref<1x32xf32, #tpu.memory_space<vmem>>, %arg20: memref<3x32x1xbf16, #tpu.memory_space<vmem>>, %arg21: memref<1x1xf32, #tpu.memory_space<vmem>>, %arg22: memref<1x32xf32, #tpu.memory_space<vmem>>, %arg23: memref<1x32xf32, #tpu.memory_space<vmem>>, %arg24: memref<1x16x1xf32, #tpu.memory_space<vmem>>, %arg25: memref<1x16x32xf32, #tpu.memory_space<vmem>>) attributes {dimension_semantics = [#tpu.dimension_semantics<parallel>], iteration_bounds = array<i64: 2>, scalar_prefetch = 0 : i64, scratch_operands = 0 : i64, tpu.core_type = #tpu.core_type<tc>, window_params = [{transform_indices = @transform_0, window_bounds = array<i64: 1, 16, 32>}, {transform_indices = @transform_1, window_bounds = array<i64: 1, 16, 1>}, {transform_indices = @transform_2, window_bounds = array<i64: 1, 8, 16>}, {pipeline_mode = #tpu.pipeline_mode<synchronous>, transform_indices = @transform_3, window_bounds = array<i64: 16, 32>}, {pipeline_mode = #tpu.pipeline_mode<synchronous>, transform_indices = @transform_4, window_bounds = array<i64: 1, 32>}, {pipeline_mode = #tpu.pipeline_mode<synchronous>, transform_indices = @transform_5, window_bounds = array<i64: 12, 32, 32>}, {pipeline_mode = #tpu.pipeline_mode<synchronous>, transform_indices = @transform_6, window_bounds = array<i64: 4, 1, 32>}, {pipeline_mode = #tpu.pipeline_mode<synchronous>, transform_indices = @transform_7, window_bounds = array<i64: 4, 1, 32>}, {pipeline_mode = #tpu.pipeline_mode<synchronous>, transform_indices = @transform_8, window_bounds = array<i64: 4, 1, 32>}, {pipeline_mode = #tpu.pipeline_mode<synchronous>, transform_indices = @transform_9, window_bounds = array<i64: 2, 32, 16>}, {pipeline_mode = #tpu.pipeline_mode<synchronous>, transform_indices = @transform_10, window_bounds = array<i64: 2, 1, 16>}, {pipeline_mode = #tpu.pipeline_mode<synchronous>, transform_indices = @transform_11, window_bounds = array<i64: 2, 32, 16>}, {pipeline_mode = #tpu.pipeline_mode<synchronous>, transform_indices = @transform_12, window_bounds = array<i64: 2, 1, 16>}, {pipeline_mode = #tpu.pipeline_mode<synchronous>, transform_indices = @transform_13, window_bounds = array<i64: 2, 32, 16>}, {pipeline_mode = #tpu.pipeline_mode<synchronous>, transform_indices = @transform_14, window_bounds = array<i64: 2, 1, 16>}, {pipeline_mode = #tpu.pipeline_mode<synchronous>, transform_indices = @transform_15, window_bounds = array<i64: 2, 16, 32>}, {pipeline_mode = #tpu.pipeline_mode<synchronous>, transform_indices = @transform_16, window_bounds = array<i64: 1, 32>}, {pipeline_mode = #tpu.pipeline_mode<synchronous>, transform_indices = @transform_17, window_bounds = array<i64: 1, 32>}, {pipeline_mode = #tpu.pipeline_mode<synchronous>, transform_indices = @transform_18, window_bounds = array<i64: 1, 32>}, {pipeline_mode = #tpu.pipeline_mode<synchronous>, transform_indices = @transform_19, window_bounds = array<i64: 3, 32, 1>}, {pipeline_mode = #tpu.pipeline_mode<synchronous>, transform_indices = @transform_20, window_bounds = array<i64: 1, 1>}, {pipeline_mode = #tpu.pipeline_mode<synchronous>, transform_indices = @transform_21, window_bounds = array<i64: 1, 32>}, {pipeline_mode = #tpu.pipeline_mode<synchronous>, transform_indices = @transform_22, window_bounds = array<i64: 1, 32>}, {transform_indices = @transform_23, window_bounds = array<i64: 1, 16, 1>}, {transform_indices = @transform_24, window_bounds = array<i64: 1, 16, 32>}]} {
    %c0 = arith.constant 0 : index
    %c0_0 = arith.constant 0 : index
    %c0_1 = arith.constant 0 : index
    %0 = vector.load %arg1[%c0, %c0_0, %c0_1] : memref<1x16x32xf32, #tpu.memory_space<vmem>>, vector<1x16x32xf32>
    %1 = vector.shape_cast %0 : vector<1x16x32xf32> to vector<16x32xf32>
    %c0_2 = arith.constant 0 : index
    %c0_3 = arith.constant 0 : index
    %c0_4 = arith.constant 0 : index
    %2 = vector.load %arg2[%c0_2, %c0_3, %c0_4] : memref<1x16x1xf32, #tpu.memory_space<vmem>>, vector<1x16x1xf32>
    %3 = vector.shape_cast %2 : vector<1x16x1xf32> to vector<16x1xf32>
    %c0_5 = arith.constant 0 : index
    %c0_6 = arith.constant 0 : index
    %c0_7 = arith.constant 0 : index
    %4 = vector.load %arg3[%c0_5, %c0_6, %c0_7] : memref<1x8x16xf32, #tpu.memory_space<vmem>>, vector<1x8x16xf32>
    %5 = vector.shape_cast %4 : vector<1x8x16xf32> to vector<8x16xf32>
    %6 = arith.truncf %5 : vector<8x16xf32> to vector<8x16xbf16>
    %c0_8 = arith.constant 0 : index
    %c0_9 = arith.constant 0 : index
    %7 = vector.load %arg4[%c0_8, %c0_9] : memref<16x32xbf16, #tpu.memory_space<vmem>>, vector<16x32xbf16>
    %cst = arith.constant dense<0.000000e+00> : vector<8x32xf32>
    %8 = tpu.matmul %6, %7, %cst {dimension_numbers = #tpu.dot_dimension_numbers<[1], [0], [0], [1], [0, 0, 1, 1], [], []>} : vector<8x16xbf16>, vector<16x32xbf16>, vector<8x32xf32> -> vector<8x32xf32>
    %c0_10 = arith.constant 0 : index
    %c0_11 = arith.constant 0 : index
    %9 = vector.load %arg5[%c0_10, %c0_11] : memref<1x32xf32, #tpu.memory_space<vmem>>, vector<1x32xf32>
    %10 = vector.broadcast %9 : vector<1x32xf32> to vector<8x32xf32>
    %11 = arith.addf %8, %10 : vector<8x32xf32>
    %12 = arith.truncf %11 : vector<8x32xf32> to vector<8x32xbf16>
    %c0_12 = arith.constant 0 : index
    %c0_13 = arith.constant 0 : index
    %13 = vector.load %arg18[%c0_12, %c0_13] : memref<1x32xf32, #tpu.memory_space<vmem>>, vector<1x32xf32>
    %c0_14 = arith.constant 0 : index
    %c0_15 = arith.constant 0 : index
    %14 = vector.load %arg19[%c0_14, %c0_15] : memref<1x32xf32, #tpu.memory_space<vmem>>, vector<1x32xf32>
    %c0_16 = arith.constant 0 : index
    %c0_17 = arith.constant 0 : index
    %c0_18 = arith.constant 0 : index
    %15 = vector.load %arg12[%c0_16, %c0_17, %c0_18] : memref<2x32x16xbf16, #tpu.memory_space<vmem>>, vector<1x32x16xbf16>
    %16 = vector.shape_cast %15 : vector<1x32x16xbf16> to vector<32x16xbf16>
    %cst_19 = arith.constant dense<0.000000e+00> : vector<8x16xf32>
    %17 = tpu.matmul %12, %16, %cst_19 {dimension_numbers = #tpu.dot_dimension_numbers<[1], [0], [0], [1], [0, 0, 1, 1], [], []>} : vector<8x32xbf16>, vector<32x16xbf16>, vector<8x16xf32> -> vector<8x16xf32>
    %c0_20 = arith.constant 0 : index
    %c0_21 = arith.constant 0 : index
    %c0_22 = arith.constant 0 : index
    %18 = vector.load %arg13[%c0_20, %c0_21, %c0_22] : memref<2x1x16xf32, #tpu.memory_space<vmem>>, vector<1x1x16xf32>
    %19 = vector.shape_cast %18 : vector<1x1x16xf32> to vector<1x16xf32>
    %20 = vector.broadcast %19 : vector<1x16xf32> to vector<8x16xf32>
    %21 = arith.addf %17, %20 : vector<8x16xf32>
    %22 = arith.truncf %21 : vector<8x16xf32> to vector<8x16xbf16>
    %c0_23 = arith.constant 0 : index
    %c0_24 = arith.constant 0 : index
    %c0_25 = arith.constant 0 : index
    %23 = vector.load %arg14[%c0_23, %c0_24, %c0_25] : memref<2x32x16xbf16, #tpu.memory_space<vmem>>, vector<1x32x16xbf16>
    %24 = vector.shape_cast %23 : vector<1x32x16xbf16> to vector<32x16xbf16>
    %cst_26 = arith.constant dense<0.000000e+00> : vector<8x16xf32>
    %25 = tpu.matmul %12, %24, %cst_26 {dimension_numbers = #tpu.dot_dimension_numbers<[1], [0], [0], [1], [0, 0, 1, 1], [], []>} : vector<8x32xbf16>, vector<32x16xbf16>, vector<8x16xf32> -> vector<8x16xf32>
    %c0_27 = arith.constant 0 : index
    %c0_28 = arith.constant 0 : index
    %c0_29 = arith.constant 0 : index
    %26 = vector.load %arg15[%c0_27, %c0_28, %c0_29] : memref<2x1x16xf32, #tpu.memory_space<vmem>>, vector<1x1x16xf32>
    %27 = vector.shape_cast %26 : vector<1x1x16xf32> to vector<1x16xf32>
    %28 = vector.broadcast %27 : vector<1x16xf32> to vector<8x16xf32>
    %29 = arith.addf %25, %28 : vector<8x16xf32>
    %30 = arith.truncf %29 : vector<8x16xf32> to vector<8x16xbf16>
    %c1 = arith.constant 1 : index
    %c0_30 = arith.constant 0 : index
    %c0_31 = arith.constant 0 : index
    %31 = vector.load %arg12[%c1, %c0_30, %c0_31] : memref<2x32x16xbf16, #tpu.memory_space<vmem>>, vector<1x32x16xbf16>
    %32 = vector.shape_cast %31 : vector<1x32x16xbf16> to vector<32x16xbf16>
    %cst_32 = arith.constant dense<0.000000e+00> : vector<8x16xf32>
    %33 = tpu.matmul %12, %32, %cst_32 {dimension_numbers = #tpu.dot_dimension_numbers<[1], [0], [0], [1], [0, 0, 1, 1], [], []>} : vector<8x32xbf16>, vector<32x16xbf16>, vector<8x16xf32> -> vector<8x16xf32>
    %c1_33 = arith.constant 1 : index
    %c0_34 = arith.constant 0 : index
    %c0_35 = arith.constant 0 : index
    %34 = vector.load %arg13[%c1_33, %c0_34, %c0_35] : memref<2x1x16xf32, #tpu.memory_space<vmem>>, vector<1x1x16xf32>
    %35 = vector.shape_cast %34 : vector<1x1x16xf32> to vector<1x16xf32>
    %36 = vector.broadcast %35 : vector<1x16xf32> to vector<8x16xf32>
    %37 = arith.addf %33, %36 : vector<8x16xf32>
    %38 = arith.truncf %37 : vector<8x16xf32> to vector<8x16xbf16>
    %c1_36 = arith.constant 1 : index
    %c0_37 = arith.constant 0 : index
    %c0_38 = arith.constant 0 : index
    %39 = vector.load %arg14[%c1_36, %c0_37, %c0_38] : memref<2x32x16xbf16, #tpu.memory_space<vmem>>, vector<1x32x16xbf16>
    %40 = vector.shape_cast %39 : vector<1x32x16xbf16> to vector<32x16xbf16>
    %cst_39 = arith.constant dense<0.000000e+00> : vector<8x16xf32>
    %41 = tpu.matmul %12, %40, %cst_39 {dimension_numbers = #tpu.dot_dimension_numbers<[1], [0], [0], [1], [0, 0, 1, 1], [], []>} : vector<8x32xbf16>, vector<32x16xbf16>, vector<8x16xf32> -> vector<8x16xf32>
    %c1_40 = arith.constant 1 : index
    %c0_41 = arith.constant 0 : index
    %c0_42 = arith.constant 0 : index
    %42 = vector.load %arg15[%c1_40, %c0_41, %c0_42] : memref<2x1x16xf32, #tpu.memory_space<vmem>>, vector<1x1x16xf32>
    %43 = vector.shape_cast %42 : vector<1x1x16xf32> to vector<1x16xf32>
    %44 = vector.broadcast %43 : vector<1x16xf32> to vector<8x16xf32>
    %45 = arith.addf %41, %44 : vector<8x16xf32>
    %46 = arith.truncf %45 : vector<8x16xf32> to vector<8x16xbf16>
    %c0_i32 = arith.constant 0 : i32
    %c2_i32 = arith.constant 2 : i32
    %47 = arith.addi %c0_i32, %c2_i32 : i32
    %c1_i32 = arith.constant 1 : i32
    %48 = scf.for %arg26 = %c0_i32 to %47 step %c1_i32 iter_args(%arg27 = %1) -> (vector<16x32xf32>)  : i32 {
      %c0_i32_74 = arith.constant 0 : i32
      %c2_i32_75 = arith.constant 2 : i32
      %112 = arith.addi %c0_i32_74, %c2_i32_75 : i32
      %c1_i32_76 = arith.constant 1 : i32
      %113 = scf.for %arg28 = %c0_i32_74 to %112 step %c1_i32_76 iter_args(%arg29 = %arg27) -> (vector<16x32xf32>)  : i32 {
        %c2_i32_118 = arith.constant 2 : i32
        %198 = arith.muli %arg26, %c2_i32_118 : i32
        %199 = arith.addi %198, %arg28 : i32
        %200 = vector.broadcast %3 : vector<16x1xf32> to vector<16x32xf32>
        %201 = arith.mulf %arg29, %200 : vector<16x32xf32>
        %c3_i32 = arith.constant 3 : i32
        %202 = arith.muli %199, %c3_i32 : i32
        %203 = arith.index_cast %199 : i32 to index
        %c0_119 = arith.constant 0 : index
        %c0_120 = arith.constant 0 : index
        %204 = vector.load %arg7[%203, %c0_119, %c0_120] : memref<4x1x32xf32, #tpu.memory_space<vmem>>, vector<1x1x32xf32>
        %205 = vector.shape_cast %204 : vector<1x1x32xf32> to vector<1x32xf32>
        %cst_121 = arith.constant 0.000000e+00 : f32
        %206 = vector.broadcast %cst_121 : f32 to vector<1x32xf32>
        %207 = vector.extract_strided_slice %201 {offsets = [0, 0], sizes = [15, 32], strides = [1, 1]} : vector<16x32xf32> to vector<15x32xf32>
        %208 = tpu.concatenate %206, %207 in 0 : vector<1x32xf32>, vector<15x32xf32> -> vector<16x32xf32>
        %209 = arith.truncf %208 : vector<16x32xf32> to vector<16x32xbf16>
        %210 = arith.index_cast %202 : i32 to index
        %c0_122 = arith.constant 0 : index
        %c0_123 = arith.constant 0 : index
        %211 = vector.load %arg6[%210, %c0_122, %c0_123] : memref<12x32x32xbf16, #tpu.memory_space<vmem>>, vector<1x32x32xbf16>
        %212 = vector.shape_cast %211 : vector<1x32x32xbf16> to vector<32x32xbf16>
        %cst_124 = arith.constant dense<0.000000e+00> : vector<16x32xf32>
        %213 = tpu.matmul %209, %212, %cst_124 {dimension_numbers = #tpu.dot_dimension_numbers<[1], [0], [0], [1], [0, 0, 1, 1], [], []>} : vector<16x32xbf16>, vector<32x32xbf16>, vector<16x32xf32> -> vector<16x32xf32>
        %214 = arith.truncf %201 : vector<16x32xf32> to vector<16x32xbf16>
        %c1_i32_125 = arith.constant 1 : i32
        %215 = arith.addi %202, %c1_i32_125 : i32
        %216 = arith.index_cast %215 : i32 to index
        %c0_126 = arith.constant 0 : index
        %c0_127 = arith.constant 0 : index
        %217 = vector.load %arg6[%216, %c0_126, %c0_127] : memref<12x32x32xbf16, #tpu.memory_space<vmem>>, vector<1x32x32xbf16>
        %218 = vector.shape_cast %217 : vector<1x32x32xbf16> to vector<32x32xbf16>
        %cst_128 = arith.constant dense<0.000000e+00> : vector<16x32xf32>
        %219 = tpu.matmul %214, %218, %cst_128 {dimension_numbers = #tpu.dot_dimension_numbers<[1], [0], [0], [1], [0, 0, 1, 1], [], []>} : vector<16x32xbf16>, vector<32x32xbf16>, vector<16x32xf32> -> vector<16x32xf32>
        %220 = arith.addf %213, %219 : vector<16x32xf32>
        %cst_129 = arith.constant 0.000000e+00 : f32
        %221 = vector.broadcast %cst_129 : f32 to vector<1x32xf32>
        %222 = vector.extract_strided_slice %201 {offsets = [1, 0], sizes = [15, 32], strides = [1, 1]} : vector<16x32xf32> to vector<15x32xf32>
        %223 = tpu.concatenate %222, %221 in 0 : vector<15x32xf32>, vector<1x32xf32> -> vector<16x32xf32>
        %224 = arith.truncf %223 : vector<16x32xf32> to vector<16x32xbf16>
        %c2_i32_130 = arith.constant 2 : i32
        %225 = arith.addi %202, %c2_i32_130 : i32
        %226 = arith.index_cast %225 : i32 to index
        %c0_131 = arith.constant 0 : index
        %c0_132 = arith.constant 0 : index
        %227 = vector.load %arg6[%226, %c0_131, %c0_132] : memref<12x32x32xbf16, #tpu.memory_space<vmem>>, vector<1x32x32xbf16>
        %228 = vector.shape_cast %227 : vector<1x32x32xbf16> to vector<32x32xbf16>
        %cst_133 = arith.constant dense<0.000000e+00> : vector<16x32xf32>
        %229 = tpu.matmul %224, %228, %cst_133 {dimension_numbers = #tpu.dot_dimension_numbers<[1], [0], [0], [1], [0, 0, 1, 1], [], []>} : vector<16x32xbf16>, vector<32x32xbf16>, vector<16x32xf32> -> vector<16x32xf32>
        %230 = arith.addf %220, %229 : vector<16x32xf32>
        %231 = vector.broadcast %205 : vector<1x32xf32> to vector<16x32xf32>
        %232 = arith.addf %230, %231 : vector<16x32xf32>
        %233 = arith.index_cast %199 : i32 to index
        %c0_134 = arith.constant 0 : index
        %c0_135 = arith.constant 0 : index
        %234 = vector.load %arg8[%233, %c0_134, %c0_135] : memref<4x1x32xf32, #tpu.memory_space<vmem>>, vector<1x1x32xf32>
        %235 = vector.shape_cast %234 : vector<1x1x32xf32> to vector<1x32xf32>
        %236 = arith.index_cast %199 : i32 to index
        %c0_136 = arith.constant 0 : index
        %c0_137 = arith.constant 0 : index
        %237 = vector.load %arg9[%236, %c0_136, %c0_137] : memref<4x1x32xf32, #tpu.memory_space<vmem>>, vector<1x1x32xf32>
        %238 = vector.shape_cast %237 : vector<1x1x32xf32> to vector<1x32xf32>
        %cst_138 = arith.constant dense<0.000000e+00> : vector<16xf32>
        %239 = vector.multi_reduction <add>, %232, %cst_138 [1] : vector<16x32xf32> to vector<16xf32>
        %240 = vector.shape_cast %239 : vector<16xf32> to vector<16x1xf32>
        %cst_139 = arith.constant 3.200000e+01 : f32
        %241 = vector.broadcast %cst_139 : f32 to vector<16x1xf32>
        %242 = arith.divf %240, %241 : vector<16x1xf32>
        %243 = vector.broadcast %242 : vector<16x1xf32> to vector<16x32xf32>
        %244 = arith.subf %232, %243 : vector<16x32xf32>
        %245 = arith.mulf %244, %244 : vector<16x32xf32>
        %cst_140 = arith.constant dense<0.000000e+00> : vector<16xf32>
        %246 = vector.multi_reduction <add>, %245, %cst_140 [1] : vector<16x32xf32> to vector<16xf32>
        %247 = vector.shape_cast %246 : vector<16xf32> to vector<16x1xf32>
        %cst_141 = arith.constant 3.200000e+01 : f32
        %248 = vector.broadcast %cst_141 : f32 to vector<16x1xf32>
        %249 = arith.divf %247, %248 : vector<16x1xf32>
        %250 = vector.broadcast %242 : vector<16x1xf32> to vector<16x32xf32>
        %251 = arith.subf %232, %250 : vector<16x32xf32>
        %cst_142 = arith.constant 9.99999974E-6 : f32
        %252 = vector.broadcast %cst_142 : f32 to vector<16x1xf32>
        %253 = arith.addf %249, %252 : vector<16x1xf32>
        %254 = math.rsqrt %253 : vector<16x1xf32>
        %255 = vector.broadcast %254 : vector<16x1xf32> to vector<16x32xf32>
        %256 = arith.mulf %251, %255 : vector<16x32xf32>
        %257 = vector.broadcast %235 : vector<1x32xf32> to vector<16x32xf32>
        %258 = arith.mulf %256, %257 : vector<16x32xf32>
        %259 = vector.broadcast %238 : vector<1x32xf32> to vector<16x32xf32>
        %260 = arith.addf %258, %259 : vector<16x32xf32>
        %cst_143 = arith.constant 0.000000e+00 : f32
        %261 = vector.broadcast %cst_143 : f32 to vector<16x32xf32>
        %262 = arith.maximumf %260, %261 : vector<16x32xf32>
        %263 = arith.addf %262, %arg29 : vector<16x32xf32>
        scf.yield %263 : vector<16x32xf32>
      }
      %c2_i32_77 = arith.constant 2 : i32
      %114 = arith.truncf %113 : vector<16x32xf32> to vector<16x32xbf16>
      %cst_78 = arith.constant 0.000000e+00 : f32
      %115 = vector.broadcast %cst_78 : f32 to vector<16x32xf32>
      %c0_79 = arith.constant 0 : index
      %c0_80 = arith.constant 0 : index
      %c0_81 = arith.constant 0 : index
      %116 = vector.load %arg10[%c0_79, %c0_80, %c0_81] : memref<2x32x16xbf16, #tpu.memory_space<vmem>>, vector<1x32x16xbf16>
      %117 = vector.shape_cast %116 : vector<1x32x16xbf16> to vector<32x16xbf16>
      %cst_82 = arith.constant dense<0.000000e+00> : vector<16x16xf32>
      %118 = tpu.matmul %114, %117, %cst_82 {dimension_numbers = #tpu.dot_dimension_numbers<[1], [0], [0], [1], [0, 0, 1, 1], [], []>} : vector<16x32xbf16>, vector<32x16xbf16>, vector<16x16xf32> -> vector<16x16xf32>
      %c0_83 = arith.constant 0 : index
      %c0_84 = arith.constant 0 : index
      %c0_85 = arith.constant 0 : index
      %119 = vector.load %arg11[%c0_83, %c0_84, %c0_85] : memref<2x1x16xf32, #tpu.memory_space<vmem>>, vector<1x1x16xf32>
      %120 = vector.shape_cast %119 : vector<1x1x16xf32> to vector<1x16xf32>
      %121 = vector.broadcast %120 : vector<1x16xf32> to vector<16x16xf32>
      %122 = arith.addf %118, %121 : vector<16x16xf32>
      %cst_86 = arith.constant 2.500000e-01 : f32
      %123 = vector.broadcast %cst_86 : f32 to vector<16x16xf32>
      %124 = arith.mulf %122, %123 : vector<16x16xf32>
      %125 = arith.truncf %124 : vector<16x16xf32> to vector<16x16xbf16>
      %cst_87 = arith.constant dense<0.000000e+00> : vector<16x8xf32>
      %126 = tpu.matmul %125, %22, %cst_87 {dimension_numbers = #tpu.dot_dimension_numbers<[1], [1], [0], [0], [0, 0, 1, 0], [], []>} : vector<16x16xbf16>, vector<8x16xbf16>, vector<16x8xf32> -> vector<16x8xf32>
      %cst_88 = arith.constant dense<0xFF800000> : vector<16xf32>
      %127 = vector.multi_reduction <maximumf>, %126, %cst_88 [1] : vector<16x8xf32> to vector<16xf32>
      %128 = vector.shape_cast %127 : vector<16xf32> to vector<16x1xf32>
      %129 = vector.broadcast %128 : vector<16x1xf32> to vector<16x8xf32>
      %130 = arith.subf %126, %129 : vector<16x8xf32>
      %131 = math.exp %130 : vector<16x8xf32>
      %cst_89 = arith.constant dense<0.000000e+00> : vector<16xf32>
      %132 = vector.multi_reduction <add>, %131, %cst_89 [1] : vector<16x8xf32> to vector<16xf32>
      %133 = vector.shape_cast %132 : vector<16xf32> to vector<16x1xf32>
      %134 = tpu.reciprocal %133 : vector<16x1xf32> -> vector<16x1xf32>
      %135 = vector.broadcast %134 : vector<16x1xf32> to vector<16x8xf32>
      %136 = arith.mulf %131, %135 : vector<16x8xf32>
      %137 = arith.truncf %136 : vector<16x8xf32> to vector<16x8xbf16>
      %cst_90 = arith.constant dense<0.000000e+00> : vector<16x16xf32>
      %138 = tpu.matmul %137, %30, %cst_90 {dimension_numbers = #tpu.dot_dimension_numbers<[1], [0], [0], [1], [0, 0, 1, 1], [], []>} : vector<16x8xbf16>, vector<8x16xbf16>, vector<16x16xf32> -> vector<16x16xf32>
      %139 = arith.truncf %138 : vector<16x16xf32> to vector<16x16xbf16>
      %c0_91 = arith.constant 0 : index
      %c0_92 = arith.constant 0 : index
      %c0_93 = arith.constant 0 : index
      %140 = vector.load %arg16[%c0_91, %c0_92, %c0_93] : memref<2x16x32xbf16, #tpu.memory_space<vmem>>, vector<1x16x32xbf16>
      %141 = vector.shape_cast %140 : vector<1x16x32xbf16> to vector<16x32xbf16>
      %cst_94 = arith.constant dense<0.000000e+00> : vector<16x32xf32>
      %142 = tpu.matmul %139, %141, %cst_94 {dimension_numbers = #tpu.dot_dimension_numbers<[1], [0], [0], [1], [0, 0, 1, 1], [], []>} : vector<16x16xbf16>, vector<16x32xbf16>, vector<16x32xf32> -> vector<16x32xf32>
      %143 = arith.addf %115, %142 : vector<16x32xf32>
      %c1_95 = arith.constant 1 : index
      %c0_96 = arith.constant 0 : index
      %c0_97 = arith.constant 0 : index
      %144 = vector.load %arg10[%c1_95, %c0_96, %c0_97] : memref<2x32x16xbf16, #tpu.memory_space<vmem>>, vector<1x32x16xbf16>
      %145 = vector.shape_cast %144 : vector<1x32x16xbf16> to vector<32x16xbf16>
      %cst_98 = arith.constant dense<0.000000e+00> : vector<16x16xf32>
      %146 = tpu.matmul %114, %145, %cst_98 {dimension_numbers = #tpu.dot_dimension_numbers<[1], [0], [0], [1], [0, 0, 1, 1], [], []>} : vector<16x32xbf16>, vector<32x16xbf16>, vector<16x16xf32> -> vector<16x16xf32>
      %c1_99 = arith.constant 1 : index
      %c0_100 = arith.constant 0 : index
      %c0_101 = arith.constant 0 : index
      %147 = vector.load %arg11[%c1_99, %c0_100, %c0_101] : memref<2x1x16xf32, #tpu.memory_space<vmem>>, vector<1x1x16xf32>
      %148 = vector.shape_cast %147 : vector<1x1x16xf32> to vector<1x16xf32>
      %149 = vector.broadcast %148 : vector<1x16xf32> to vector<16x16xf32>
      %150 = arith.addf %146, %149 : vector<16x16xf32>
      %cst_102 = arith.constant 2.500000e-01 : f32
      %151 = vector.broadcast %cst_102 : f32 to vector<16x16xf32>
      %152 = arith.mulf %150, %151 : vector<16x16xf32>
      %153 = arith.truncf %152 : vector<16x16xf32> to vector<16x16xbf16>
      %cst_103 = arith.constant dense<0.000000e+00> : vector<16x8xf32>
      %154 = tpu.matmul %153, %38, %cst_103 {dimension_numbers = #tpu.dot_dimension_numbers<[1], [1], [0], [0], [0, 0, 1, 0], [], []>} : vector<16x16xbf16>, vector<8x16xbf16>, vector<16x8xf32> -> vector<16x8xf32>
      %cst_104 = arith.constant dense<0xFF800000> : vector<16xf32>
      %155 = vector.multi_reduction <maximumf>, %154, %cst_104 [1] : vector<16x8xf32> to vector<16xf32>
      %156 = vector.shape_cast %155 : vector<16xf32> to vector<16x1xf32>
      %157 = vector.broadcast %156 : vector<16x1xf32> to vector<16x8xf32>
      %158 = arith.subf %154, %157 : vector<16x8xf32>
      %159 = math.exp %158 : vector<16x8xf32>
      %cst_105 = arith.constant dense<0.000000e+00> : vector<16xf32>
      %160 = vector.multi_reduction <add>, %159, %cst_105 [1] : vector<16x8xf32> to vector<16xf32>
      %161 = vector.shape_cast %160 : vector<16xf32> to vector<16x1xf32>
      %162 = tpu.reciprocal %161 : vector<16x1xf32> -> vector<16x1xf32>
      %163 = vector.broadcast %162 : vector<16x1xf32> to vector<16x8xf32>
      %164 = arith.mulf %159, %163 : vector<16x8xf32>
      %165 = arith.truncf %164 : vector<16x8xf32> to vector<16x8xbf16>
      %cst_106 = arith.constant dense<0.000000e+00> : vector<16x16xf32>
      %166 = tpu.matmul %165, %46, %cst_106 {dimension_numbers = #tpu.dot_dimension_numbers<[1], [0], [0], [1], [0, 0, 1, 1], [], []>} : vector<16x8xbf16>, vector<8x16xbf16>, vector<16x16xf32> -> vector<16x16xf32>
      %167 = arith.truncf %166 : vector<16x16xf32> to vector<16x16xbf16>
      %c1_107 = arith.constant 1 : index
      %c0_108 = arith.constant 0 : index
      %c0_109 = arith.constant 0 : index
      %168 = vector.load %arg16[%c1_107, %c0_108, %c0_109] : memref<2x16x32xbf16, #tpu.memory_space<vmem>>, vector<1x16x32xbf16>
      %169 = vector.shape_cast %168 : vector<1x16x32xbf16> to vector<16x32xbf16>
      %cst_110 = arith.constant dense<0.000000e+00> : vector<16x32xf32>
      %170 = tpu.matmul %167, %169, %cst_110 {dimension_numbers = #tpu.dot_dimension_numbers<[1], [0], [0], [1], [0, 0, 1, 1], [], []>} : vector<16x16xbf16>, vector<16x32xbf16>, vector<16x32xf32> -> vector<16x32xf32>
      %171 = arith.addf %143, %170 : vector<16x32xf32>
      %c0_111 = arith.constant 0 : index
      %c0_112 = arith.constant 0 : index
      %172 = vector.load %arg17[%c0_111, %c0_112] : memref<1x32xf32, #tpu.memory_space<vmem>>, vector<1x32xf32>
      %173 = vector.broadcast %172 : vector<1x32xf32> to vector<16x32xf32>
      %174 = arith.addf %171, %173 : vector<16x32xf32>
      %175 = arith.addf %174, %113 : vector<16x32xf32>
      %cst_113 = arith.constant dense<0.000000e+00> : vector<16xf32>
      %176 = vector.multi_reduction <add>, %175, %cst_113 [1] : vector<16x32xf32> to vector<16xf32>
      %177 = vector.shape_cast %176 : vector<16xf32> to vector<16x1xf32>
      %cst_114 = arith.constant 3.200000e+01 : f32
      %178 = vector.broadcast %cst_114 : f32 to vector<16x1xf32>
      %179 = arith.divf %177, %178 : vector<16x1xf32>
      %180 = vector.broadcast %179 : vector<16x1xf32> to vector<16x32xf32>
      %181 = arith.subf %175, %180 : vector<16x32xf32>
      %182 = arith.mulf %181, %181 : vector<16x32xf32>
      %cst_115 = arith.constant dense<0.000000e+00> : vector<16xf32>
      %183 = vector.multi_reduction <add>, %182, %cst_115 [1] : vector<16x32xf32> to vector<16xf32>
      %184 = vector.shape_cast %183 : vector<16xf32> to vector<16x1xf32>
      %cst_116 = arith.constant 3.200000e+01 : f32
      %185 = vector.broadcast %cst_116 : f32 to vector<16x1xf32>
      %186 = arith.divf %184, %185 : vector<16x1xf32>
      %187 = vector.broadcast %179 : vector<16x1xf32> to vector<16x32xf32>
      %188 = arith.subf %175, %187 : vector<16x32xf32>
      %cst_117 = arith.constant 9.99999974E-6 : f32
      %189 = vector.broadcast %cst_117 : f32 to vector<16x1xf32>
      %190 = arith.addf %186, %189 : vector<16x1xf32>
      %191 = math.rsqrt %190 : vector<16x1xf32>
      %192 = vector.broadcast %191 : vector<16x1xf32> to vector<16x32xf32>
      %193 = arith.mulf %188, %192 : vector<16x32xf32>
      %194 = vector.broadcast %13 : vector<1x32xf32> to vector<16x32xf32>
      %195 = arith.mulf %193, %194 : vector<16x32xf32>
      %196 = vector.broadcast %14 : vector<1x32xf32> to vector<16x32xf32>
      %197 = arith.addf %195, %196 : vector<16x32xf32>
      scf.yield %197 : vector<16x32xf32>
    }
    %c2_i32_43 = arith.constant 2 : i32
    %49 = vector.broadcast %3 : vector<16x1xf32> to vector<16x32xf32>
    %50 = arith.mulf %48, %49 : vector<16x32xf32>
    %c0_44 = arith.constant 0 : index
    %c0_45 = arith.constant 0 : index
    %51 = vector.load %arg21[%c0_44, %c0_45] : memref<1x1xf32, #tpu.memory_space<vmem>>, vector<1x1xf32>
    %cst_46 = arith.constant 0.000000e+00 : f32
    %52 = vector.broadcast %cst_46 : f32 to vector<1x32xf32>
    %53 = vector.extract_strided_slice %50 {offsets = [0, 0], sizes = [15, 32], strides = [1, 1]} : vector<16x32xf32> to vector<15x32xf32>
    %54 = tpu.concatenate %52, %53 in 0 : vector<1x32xf32>, vector<15x32xf32> -> vector<16x32xf32>
    %55 = arith.truncf %54 : vector<16x32xf32> to vector<16x32xbf16>
    %c0_47 = arith.constant 0 : index
    %c0_48 = arith.constant 0 : index
    %c0_49 = arith.constant 0 : index
    %56 = vector.load %arg20[%c0_47, %c0_48, %c0_49] : memref<3x32x1xbf16, #tpu.memory_space<vmem>>, vector<1x32x1xbf16>
    %57 = vector.shape_cast %56 : vector<1x32x1xbf16> to vector<32x1xbf16>
    %cst_50 = arith.constant dense<0.000000e+00> : vector<16x1xf32>
    %58 = tpu.matmul %55, %57, %cst_50 {dimension_numbers = #tpu.dot_dimension_numbers<[1], [0], [0], [1], [0, 0, 1, 1], [], []>} : vector<16x32xbf16>, vector<32x1xbf16>, vector<16x1xf32> -> vector<16x1xf32>
    %59 = arith.truncf %50 : vector<16x32xf32> to vector<16x32xbf16>
    %c1_51 = arith.constant 1 : index
    %c0_52 = arith.constant 0 : index
    %c0_53 = arith.constant 0 : index
    %60 = vector.load %arg20[%c1_51, %c0_52, %c0_53] : memref<3x32x1xbf16, #tpu.memory_space<vmem>>, vector<1x32x1xbf16>
    %61 = vector.shape_cast %60 : vector<1x32x1xbf16> to vector<32x1xbf16>
    %cst_54 = arith.constant dense<0.000000e+00> : vector<16x1xf32>
    %62 = tpu.matmul %59, %61, %cst_54 {dimension_numbers = #tpu.dot_dimension_numbers<[1], [0], [0], [1], [0, 0, 1, 1], [], []>} : vector<16x32xbf16>, vector<32x1xbf16>, vector<16x1xf32> -> vector<16x1xf32>
    %63 = arith.addf %58, %62 : vector<16x1xf32>
    %cst_55 = arith.constant 0.000000e+00 : f32
    %64 = vector.broadcast %cst_55 : f32 to vector<1x32xf32>
    %65 = vector.extract_strided_slice %50 {offsets = [1, 0], sizes = [15, 32], strides = [1, 1]} : vector<16x32xf32> to vector<15x32xf32>
    %66 = tpu.concatenate %65, %64 in 0 : vector<15x32xf32>, vector<1x32xf32> -> vector<16x32xf32>
    %67 = arith.truncf %66 : vector<16x32xf32> to vector<16x32xbf16>
    %c2 = arith.constant 2 : index
    %c0_56 = arith.constant 0 : index
    %c0_57 = arith.constant 0 : index
    %68 = vector.load %arg20[%c2, %c0_56, %c0_57] : memref<3x32x1xbf16, #tpu.memory_space<vmem>>, vector<1x32x1xbf16>
    %69 = vector.shape_cast %68 : vector<1x32x1xbf16> to vector<32x1xbf16>
    %cst_58 = arith.constant dense<0.000000e+00> : vector<16x1xf32>
    %70 = tpu.matmul %67, %69, %cst_58 {dimension_numbers = #tpu.dot_dimension_numbers<[1], [0], [0], [1], [0, 0, 1, 1], [], []>} : vector<16x32xbf16>, vector<32x1xbf16>, vector<16x1xf32> -> vector<16x1xf32>
    %71 = arith.addf %63, %70 : vector<16x1xf32>
    %72 = vector.broadcast %51 : vector<1x1xf32> to vector<16x1xf32>
    %73 = arith.addf %71, %72 : vector<16x1xf32>
    %74 = arith.mulf %73, %3 : vector<16x1xf32>
    %c0_59 = arith.constant 0 : index
    %c0_60 = arith.constant 0 : index
    %c0_61 = arith.constant 0 : index
    %75 = vector.load %arg24[%c0_59, %c0_60, %c0_61] : memref<1x16x1xf32, #tpu.memory_space<vmem>>, vector<1x16x1xf32>
    %76 = vector.shape_cast %75 : vector<1x16x1xf32> to vector<16x1xf32>
    %77 = vector.shape_cast %74 : vector<16x1xf32> to vector<1x16x1xf32>
    tpu.vector_store %arg24[%c0_59, %c0_60, %c0_61], %77 {strides = array<i32>} : memref<1x16x1xf32, #tpu.memory_space<vmem>>, vector<1x16x1xf32>,
    %c0_62 = arith.constant 0 : index
    %c0_63 = arith.constant 0 : index
    %78 = vector.load %arg22[%c0_62, %c0_63] : memref<1x32xf32, #tpu.memory_space<vmem>>, vector<1x32xf32>
    %79 = vector.broadcast %74 : vector<16x1xf32> to vector<16x32xf32>
    %80 = vector.broadcast %78 : vector<1x32xf32> to vector<16x32xf32>
    %81 = arith.mulf %79, %80 : vector<16x32xf32>
    %c0_64 = arith.constant 0 : index
    %c0_65 = arith.constant 0 : index
    %82 = vector.load %arg23[%c0_64, %c0_65] : memref<1x32xf32, #tpu.memory_space<vmem>>, vector<1x32xf32>
    %83 = vector.broadcast %82 : vector<1x32xf32> to vector<16x32xf32>
    %84 = arith.addf %81, %83 : vector<16x32xf32>
    %cst_66 = arith.constant dense<0.000000e+00> : vector<16xf32>
    %85 = vector.multi_reduction <add>, %84, %cst_66 [1] : vector<16x32xf32> to vector<16xf32>
    %86 = vector.shape_cast %85 : vector<16xf32> to vector<16x1xf32>
    %cst_67 = arith.constant 3.200000e+01 : f32
    %87 = vector.broadcast %cst_67 : f32 to vector<16x1xf32>
    %88 = arith.divf %86, %87 : vector<16x1xf32>
    %89 = vector.broadcast %88 : vector<16x1xf32> to vector<16x32xf32>
    %90 = arith.subf %84, %89 : vector<16x32xf32>
    %91 = arith.mulf %90, %90 : vector<16x32xf32>
    %cst_68 = arith.constant dense<0.000000e+00> : vector<16xf32>
    %92 = vector.multi_reduction <add>, %91, %cst_68 [1] : vector<16x32xf32> to vector<16xf32>
    %93 = vector.shape_cast %92 : vector<16xf32> to vector<16x1xf32>
    %cst_69 = arith.constant 3.200000e+01 : f32
    %94 = vector.broadcast %cst_69 : f32 to vector<16x1xf32>
    %95 = arith.divf %93, %94 : vector<16x1xf32>
    %96 = vector.broadcast %88 : vector<16x1xf32> to vector<16x32xf32>
    %97 = arith.subf %84, %96 : vector<16x32xf32>
    %cst_70 = arith.constant 9.99999974E-6 : f32
    %98 = vector.broadcast %cst_70 : f32 to vector<16x1xf32>
    %99 = arith.addf %95, %98 : vector<16x1xf32>
    %100 = math.rsqrt %99 : vector<16x1xf32>
    %101 = vector.broadcast %100 : vector<16x1xf32> to vector<16x32xf32>
    %102 = arith.mulf %97, %101 : vector<16x32xf32>
    %103 = vector.broadcast %13 : vector<1x32xf32> to vector<16x32xf32>
    %104 = arith.mulf %102, %103 : vector<16x32xf32>
    %105 = vector.broadcast %14 : vector<1x32xf32> to vector<16x32xf32>
    %106 = arith.addf %104, %105 : vector<16x32xf32>
    %107 = vector.broadcast %3 : vector<16x1xf32> to vector<16x32xf32>
    %108 = arith.mulf %106, %107 : vector<16x32xf32>
    %c0_71 = arith.constant 0 : index
    %c0_72 = arith.constant 0 : index
    %c0_73 = arith.constant 0 : index
    %109 = vector.load %arg25[%c0_71, %c0_72, %c0_73] : memref<1x16x32xf32, #tpu.memory_space<vmem>>, vector<1x16x32xf32>
    %110 = vector.shape_cast %109 : vector<1x16x32xf32> to vector<16x32xf32>
    %111 = vector.shape_cast %108 : vector<16x32xf32> to vector<1x16x32xf32>
    tpu.vector_store %arg25[%c0_71, %c0_72, %c0_73], %111 {strides = array<i32>} : memref<1x16x32xf32, #tpu.memory_space<vmem>>, vector<1x16x32xf32>,
    return
  }
  func.func @transform_0(%arg0: i32) -> (i32, i32, i32) {
    %c0_i32 = arith.constant 0 : i32
    %c0_i32_0 = arith.constant 0 : i32
    %c0_i32_1 = arith.constant 0 : i32
    return %arg0, %c0_i32, %c0_i32_0 : i32, i32, i32
  }
  func.func @transform_1(%arg0: i32) -> (i32, i32, i32) {
    %c0_i32 = arith.constant 0 : i32
    %c0_i32_0 = arith.constant 0 : i32
    %c0_i32_1 = arith.constant 0 : i32
    return %arg0, %c0_i32, %c0_i32_0 : i32, i32, i32
  }
  func.func @transform_2(%arg0: i32) -> (i32, i32, i32) {
    %c0_i32 = arith.constant 0 : i32
    %c0_i32_0 = arith.constant 0 : i32
    %c0_i32_1 = arith.constant 0 : i32
    return %arg0, %c0_i32, %c0_i32_0 : i32, i32, i32
  }
  func.func @transform_3(%arg0: i32) -> (i32, i32) {
    %c0_i32 = arith.constant 0 : i32
    %c0_i32_0 = arith.constant 0 : i32
    %c0_i32_1 = arith.constant 0 : i32
    return %c0_i32, %c0_i32_0 : i32, i32
  }
  func.func @transform_4(%arg0: i32) -> (i32, i32) {
    %c0_i32 = arith.constant 0 : i32
    %c0_i32_0 = arith.constant 0 : i32
    %c0_i32_1 = arith.constant 0 : i32
    return %c0_i32, %c0_i32_0 : i32, i32
  }
  func.func @transform_5(%arg0: i32) -> (i32, i32, i32) {
    %c0_i32 = arith.constant 0 : i32
    %c0_i32_0 = arith.constant 0 : i32
    %c0_i32_1 = arith.constant 0 : i32
    %c0_i32_2 = arith.constant 0 : i32
    return %c0_i32, %c0_i32_0, %c0_i32_1 : i32, i32, i32
  }
  func.func @transform_6(%arg0: i32) -> (i32, i32, i32) {
    %c0_i32 = arith.constant 0 : i32
    %c0_i32_0 = arith.constant 0 : i32
    %c0_i32_1 = arith.constant 0 : i32
    %c0_i32_2 = arith.constant 0 : i32
    return %c0_i32, %c0_i32_0, %c0_i32_1 : i32, i32, i32
  }
  func.func @transform_7(%arg0: i32) -> (i32, i32, i32) {
    %c0_i32 = arith.constant 0 : i32
    %c0_i32_0 = arith.constant 0 : i32
    %c0_i32_1 = arith.constant 0 : i32
    %c0_i32_2 = arith.constant 0 : i32
    return %c0_i32, %c0_i32_0, %c0_i32_1 : i32, i32, i32
  }
  func.func @transform_8(%arg0: i32) -> (i32, i32, i32) {
    %c0_i32 = arith.constant 0 : i32
    %c0_i32_0 = arith.constant 0 : i32
    %c0_i32_1 = arith.constant 0 : i32
    %c0_i32_2 = arith.constant 0 : i32
    return %c0_i32, %c0_i32_0, %c0_i32_1 : i32, i32, i32
  }
  func.func @transform_9(%arg0: i32) -> (i32, i32, i32) {
    %c0_i32 = arith.constant 0 : i32
    %c0_i32_0 = arith.constant 0 : i32
    %c0_i32_1 = arith.constant 0 : i32
    %c0_i32_2 = arith.constant 0 : i32
    return %c0_i32, %c0_i32_0, %c0_i32_1 : i32, i32, i32
  }
  func.func @transform_10(%arg0: i32) -> (i32, i32, i32) {
    %c0_i32 = arith.constant 0 : i32
    %c0_i32_0 = arith.constant 0 : i32
    %c0_i32_1 = arith.constant 0 : i32
    %c0_i32_2 = arith.constant 0 : i32
    return %c0_i32, %c0_i32_0, %c0_i32_1 : i32, i32, i32
  }
  func.func @transform_11(%arg0: i32) -> (i32, i32, i32) {
    %c0_i32 = arith.constant 0 : i32
    %c0_i32_0 = arith.constant 0 : i32
    %c0_i32_1 = arith.constant 0 : i32
    %c0_i32_2 = arith.constant 0 : i32
    return %c0_i32, %c0_i32_0, %c0_i32_1 : i32, i32, i32
  }
  func.func @transform_12(%arg0: i32) -> (i32, i32, i32) {
    %c0_i32 = arith.constant 0 : i32
    %c0_i32_0 = arith.constant 0 : i32
    %c0_i32_1 = arith.constant 0 : i32
    %c0_i32_2 = arith.constant 0 : i32
    return %c0_i32, %c0_i32_0, %c0_i32_1 : i32, i32, i32
  }
  func.func @transform_13(%arg0: i32) -> (i32, i32, i32) {
    %c0_i32 = arith.constant 0 : i32
    %c0_i32_0 = arith.constant 0 : i32
    %c0_i32_1 = arith.constant 0 : i32
    %c0_i32_2 = arith.constant 0 : i32
    return %c0_i32, %c0_i32_0, %c0_i32_1 : i32, i32, i32
  }
  func.func @transform_14(%arg0: i32) -> (i32, i32, i32) {
    %c0_i32 = arith.constant 0 : i32
    %c0_i32_0 = arith.constant 0 : i32
    %c0_i32_1 = arith.constant 0 : i32
    %c0_i32_2 = arith.constant 0 : i32
    return %c0_i32, %c0_i32_0, %c0_i32_1 : i32, i32, i32
  }
  func.func @transform_15(%arg0: i32) -> (i32, i32, i32) {
    %c0_i32 = arith.constant 0 : i32
    %c0_i32_0 = arith.constant 0 : i32
    %c0_i32_1 = arith.constant 0 : i32
    %c0_i32_2 = arith.constant 0 : i32
    return %c0_i32, %c0_i32_0, %c0_i32_1 : i32, i32, i32
  }
  func.func @transform_16(%arg0: i32) -> (i32, i32) {
    %c0_i32 = arith.constant 0 : i32
    %c0_i32_0 = arith.constant 0 : i32
    %c0_i32_1 = arith.constant 0 : i32
    return %c0_i32, %c0_i32_0 : i32, i32
  }
  func.func @transform_17(%arg0: i32) -> (i32, i32) {
    %c0_i32 = arith.constant 0 : i32
    %c0_i32_0 = arith.constant 0 : i32
    %c0_i32_1 = arith.constant 0 : i32
    return %c0_i32, %c0_i32_0 : i32, i32
  }
  func.func @transform_18(%arg0: i32) -> (i32, i32) {
    %c0_i32 = arith.constant 0 : i32
    %c0_i32_0 = arith.constant 0 : i32
    %c0_i32_1 = arith.constant 0 : i32
    return %c0_i32, %c0_i32_0 : i32, i32
  }
  func.func @transform_19(%arg0: i32) -> (i32, i32, i32) {
    %c0_i32 = arith.constant 0 : i32
    %c0_i32_0 = arith.constant 0 : i32
    %c0_i32_1 = arith.constant 0 : i32
    %c0_i32_2 = arith.constant 0 : i32
    return %c0_i32, %c0_i32_0, %c0_i32_1 : i32, i32, i32
  }
  func.func @transform_20(%arg0: i32) -> (i32, i32) {
    %c0_i32 = arith.constant 0 : i32
    %c0_i32_0 = arith.constant 0 : i32
    %c0_i32_1 = arith.constant 0 : i32
    return %c0_i32, %c0_i32_0 : i32, i32
  }
  func.func @transform_21(%arg0: i32) -> (i32, i32) {
    %c0_i32 = arith.constant 0 : i32
    %c0_i32_0 = arith.constant 0 : i32
    %c0_i32_1 = arith.constant 0 : i32
    return %c0_i32, %c0_i32_0 : i32, i32
  }
  func.func @transform_22(%arg0: i32) -> (i32, i32) {
    %c0_i32 = arith.constant 0 : i32
    %c0_i32_0 = arith.constant 0 : i32
    %c0_i32_1 = arith.constant 0 : i32
    return %c0_i32, %c0_i32_0 : i32, i32
  }
  func.func @transform_23(%arg0: i32) -> (i32, i32, i32) {
    %c0_i32 = arith.constant 0 : i32
    %c0_i32_0 = arith.constant 0 : i32
    %c0_i32_1 = arith.constant 0 : i32
    return %arg0, %c0_i32, %c0_i32_0 : i32, i32, i32
  }
  func.func @transform_24(%arg0: i32) -> (i32, i32, i32) {
    %c0_i32 = arith.constant 0 : i32
    %c0_i32_0 = arith.constant 0 : i32
    %c0_i32_1 = arith.constant 0 : i32
    return %arg0, %c0_i32, %c0_i32_0 : i32, i32, i32
  }
}

</mosaic_0001>

<bundles_post_ra>
// kernel: tpu_custom_call.1
= control target key start
LH: loop header
LB: loop body
LE: loop exit
PB: predicated region body
PF: predicated region fallthrough
CT: control target
= control target key end

     0   :  { %s4377_s0 = inlined_call_operand.vmem [shape: f32[2,16,32], index: 0, kind: input, shape index: {}]   ;;  %s4378_s1 = inlined_call_operand.vmem [shape: f32[2,16,1], index: 1, kind: input, shape index: {}]   ;;  %s4379_s2 = inlined_call_operand.hbm [shape: f32[2,8,16], index: 2, kind: input, shape index: {}]   ;;  %s4380_s3 = inlined_call_operand.hbm [shape: bf16[16,32], index: 3, kind: input, shape index: {}]   ;;  %s4381_s4 = inlined_call_operand.hbm [shape: f32[1,32], index: 4, kind: input, shape index: {}]   ;;  %s4382_s5 = inlined_call_operand.vmem [shape: bf16[12,32,32], index: 5, kind: input, shape index: {}]   ;;  %s4383_s6 = inlined_call_operand.hbm [shape: f32[4,1,32], index: 6, kind: input, shape index: {}]   ;;  %s4384_s7 = inlined_call_operand.hbm [shape: f32[4,1,32], index: 7, kind: input, shape index: {}]   ;;  %s4385_s8 = inlined_call_operand.hbm [shape: f32[4,1,32], index: 8, kind: input, shape index: {}]   ;;  %s4386_s9 = inlined_call_operand.vmem [shape: bf16[2,32,16], index: 9, kind: input, shape index: {}]   ;;  %s4387_s10 = inlined_call_operand.hbm [shape: f32[2,1,16], index: 10, kind: input, shape index: {}]   ;;  %s4388_s11 = inlined_call_operand.vmem [shape: bf16[2,32,16], index: 11, kind: input, shape index: {}]   ;;  %s4389_s12 = inlined_call_operand.hbm [shape: f32[2,1,16], index: 12, kind: input, shape index: {}]   ;;  %s4390_s13 = inlined_call_operand.vmem [shape: bf16[2,32,16], index: 13, kind: input, shape index: {}]   ;;  %s4391_s14 = inlined_call_operand.hbm [shape: f32[2,1,16], index: 14, kind: input, shape index: {}]   ;;  %s4392_s15 = inlined_call_operand.vmem [shape: bf16[2,16,32], index: 15, kind: input, shape index: {}]   ;;  %s4393_s16 = inlined_call_operand.vmem [shape: f32[1,32], index: 16, kind: input, shape index: {}]   ;;  %s4394_s17 = inlined_call_operand.vmem [shape: f32[1,32], index: 17, kind: input, shape index: {}]   ;;  %s4395_s18 = inlined_call_operand.vmem [shape: f32[1,32], index: 18, kind: input, shape index: {}]   ;;  %s4396_s19 = inlined_call_operand.vmem [shape: bf16[3,32,1], index: 19, kind: input, shape index: {}]   ;;  %s4397_s20 = inlined_call_operand.<no memory space> [shape: f32[1,1], index: 20, kind: input, shape index: {}]   ;;  %s4398_s21 = inlined_call_operand.vmem [shape: f32[1,32], index: 21, kind: input, shape index: {}]   ;;  %s4399_s22 = inlined_call_operand.vmem [shape: f32[1,32], index: 22, kind: input, shape index: {}]   ;;  %s4400_s23 = inlined_call_operand.vmem [shape: f32[2,16,1], index: 23, kind: output, shape index: {0}]   ;;  %s4401_s24 = inlined_call_operand.hbm [shape: f32[2,16,32], index: 24, kind: output, shape index: {1}]  }
   0x1   :  { %4414 = sst [smem:[#allocation28_spill]] %s4377_s0  ;;  %v30_v0 = vstv %s4397_s20 }
   0x2   :  { %4415 = sst [smem:[#allocation29_spill]] %s4378_s1  ;;  %31 = vst [vmem:[#allocation2] sm:$0x1] %v30_v0 }
   0x3   :  { %4416 = sst [smem:[#allocation30_spill]] %s4379_s2 }
   0x4   :  { %4417 = sst [smem:[#allocation31_spill]] %s4380_s3 }
   0x5   :  { %4418 = sst [smem:[#allocation32_spill]] %s4381_s4 }
   0x6   :  { %4419 = sst [smem:[#allocation33_spill]] %s4382_s5 }
   0x7   :  { %4420 = sst [smem:[#allocation34_spill]] %s4383_s6 }
   0x8   :  { %4421 = sst [smem:[#allocation35_spill]] %s4384_s7 }
   0x9   :  { %4422 = sst [smem:[#allocation36_spill]] %s4385_s8 }
   0xa   :  { %4423 = sst [smem:[#allocation37_spill]] %s4387_s10 }
   0xb   :  { %4424 = sst [smem:[#allocation38_spill]] %s4389_s12 }
   0xc   :  { %4425 = sst [smem:[#allocation39_spill]] %s4391_s14 }
   0xd   :  { %4426 = sst [smem:[#allocation40_spill]] %s4396_s19 }
   0xe   :  { %4427 = sst [smem:[#allocation41_spill]] %s4398_s21 }
   0xf   :  { %4428 = sst [smem:[#allocation42_spill]] %s4399_s22 }
  0x10   :  { %4429 = sst [smem:[#allocation43_spill]] %s4401_s24 }
  0x11   :  { %32 = vsyncpa [#allocation4], 0 }
  0x12   :  { %34 = vsyncpa [#allocation4 + $0x1], 0 }
  0x13   :  { %35 = vsyncpa [#allocation7], 0 }
  0x14   :  { %36 = vsyncpa [#allocation10], 0 }
  0x15   :  { %37 = vsyncpa [#allocation13], 0 }
  0x16   :  { %38 = vsyncpa [#allocation16], 0 }
  0x17   :  { %39 = vsyncpa [#allocation5], 0 }
  0x18   :  { %41 = vsyncpa [#allocation5 + $0x1], 0  ;;  %s3759_s27 = smov 0   ;;  %s3761_s28 = smov 0  }
  0x19   :  { %s3763_s6 = smov 0   ;;  %s3765_s2 = smov 0  }
  0x1a LB: > { %4430 = sst [smem:[#allocation25_spill]] %s3577_s6  ;;  %s3607_s20 = smov [#allocation6]   ;;  %s3581_s2 = sphi %s3765_s2, %s4477_s2   ;;  %s3577_s6 = sphi %s3763_s6, %s4479_s6   ;;  %s3573_s28 = sphi %s3761_s28, %s4481_s28   ;;  %s3569_s27 = sphi %s3759_s27, %s4480_s27  }
  0x1b   : > { %s614_s29 = sshll.u32 %s3607_s20, 4  ;;  %s3780_s0 = sadd.s32 4294967295, %s3581_s2   ;;  %s615_s29 = int_to_ptr.vmem [resolvable:$true] %s614_s29 }
  0x1c   : > { %p2668_p0 = scmp.ge.s32.totalorder %s3581_s2, 1  ;;  %p4407_p1 = scmp.eq.s32.totalorder %s3780_s0, 0 }
  0x1d   : > { %p602_p2 = scmp.lt.s32.totalorder %s3581_s2, 3  ;;  %s3608_s30 = smov [#allocation9]  }
  0x1e   : > { %s641_s3 = sshll.u32 %s3608_s30, 4  ;;  %s3609_s8 = smov [#allocation12]   ;;  %s3798_s3 = int_to_ptr.vmem [resolvable:$true] %s641_s3 }
  0x1f   : > { %p3785_p3 = pnand %p2668_p0, %p602_p2  ;;  %s3800_s4 = sshll.u32 %s3609_s8, 4  ;;  %s668_s4 = int_to_ptr.vmem [resolvable:$true] %s3800_s4 }
  0x20   : > { %s3252_s5 = scalar_lea.vmem %s615_s29, 128  ;;  %p3260_p11 = scmp.lt.s32.totalorder %s615_s29, %s615_s29 }
  0x21   : > { %s4431_s7 = scalar_select %p3785_p3, 1, 0 }
  0x22   : > { %p3030_p5 = pneg %p3785_p3  ;;  %p3253_p8 = scmp.ne.s32.totalorder %s615_s29, %s3252_s5 }
  0x23   : > { %p3261_p12 = scmp.lt.s32.totalorder %s3252_s5, %s3252_s5 }
  0x24   : > { %p3794_p6 = pnand %p3030_p5, %p4407_p1 }
  0x25   : > { %p3262_p13 = por %p3261_p12, %p3260_p11 }
  0x26   : > { %p3804_p7 = pneg %p3794_p6 }
  0x28   : > { %p3255_p9 = pnand %p3253_p8, %p3804_p7 }
  0x2a   : > { %p3256_p10 = pneg %p3255_p9 }
  0x2c   : > { %p3263_p0 = pnand %p3262_p13, %p3256_p10 }
  0x2e   : > { %3266 = shalt.err (!%p3263_p0)
}
  0x2f   : > { %s3610_s26 = smov 64   ;;  %s3611_s20 = smov 4  }
  0x30   : > { %s4434_s24 = sld [smem:[#allocation31_spill]]  ;;  %s3278_s22 = scalar_lea.vmem %s3798_s3, 64 }
  0x31   : > { %p3279_p2 = scmp.ne.s32.totalorder %s3798_s3, %s3278_s22  ;;  %p3286_p9 = scmp.lt.s32.totalorder %s3798_s3, %s3798_s3 }
  0x32   : > { %p3287_p10 = scmp.lt.s32.totalorder %s3278_s22, %s3278_s22 }
  0x33   : > { %p3281_p5 = pnand %p3279_p2, %p3804_p7 }
  0x34   : > { %p3288_p11 = por %p3287_p10, %p3286_p9 }
  0x35   : > { %p3282_p8 = pneg %p3281_p5 }
  0x36   : > { %3033 = dma.hbm_to_vmem [thread:$0]  (!%p3794_p6), %s4434_s24, 128, %s615_s29, [#allocation7], %s3610_s26, %s3610_s26, %s3611_s20  }
  0x37   : > { %p3289_p12 = pnand %p3288_p11, %p3282_p8 }
  0x39   : > { %3292 = shalt.err (!%p3289_p12)
}
  0x3a   : > { %s4405_s5 = smov 16   ;;  %s3613_s21 = smov 1  }
  0x3b   : > { %s4435_s26 = sld [smem:[#allocation34_spill]]  ;;  %s3304_s20 = scalar_lea.vmem %s668_s4, 64 }
  0x3c   : > { %p3305_p13 = scmp.ne.s32.totalorder %s668_s4, %s3304_s20  ;;  %p3312_p5 = scmp.lt.s32.totalorder %s668_s4, %s668_s4 }
  0x3d   : > { %p3313_p8 = scmp.lt.s32.totalorder %s3304_s20, %s3304_s20 }
  0x3e   : > { %p3307_p0 = pnand %p3305_p13, %p3804_p7 }
  0x3f   : > { %p3314_p9 = por %p3313_p8, %p3312_p5 }
  0x40   : > { %p3308_p2 = pneg %p3307_p0 }
  0x41   : > { %3039 = dma.hbm_to_vmem [thread:$0]  (!%p3794_p6), %s4435_s26, 64, %s3798_s3, [#allocation10], %s4405_s5, %s4405_s5, %s3613_s21  }
  0x42   : > { %p3315_p10 = pnand %p3314_p9, %p3308_p2 }
  0x44   : > { %3318 = shalt.err (!%p3315_p10)
}
  0x45   : > { %s4436_s8 = sld [smem:[#allocation36_spill]]  ;;  %s3614_s3 = smov [#allocation15]  }
  0x46   : > { %s699_s24 = sshll.u32 %s3614_s3, 4  ;;  %s3615_s29 = smov [#allocation8]   ;;  %s700_s24 = int_to_ptr.vmem [resolvable:$true] %s699_s24 }
  0x47   : > { %s628_s26 = sshll.u32 %s3615_s29, 4  ;;  %s3330_s19 = scalar_lea.vmem %s700_s24, 32  ;;  %s629_s26 = int_to_ptr.vmem [resolvable:$true] %s628_s26 }
  0x48   : > { %p3331_p11 = scmp.ne.s32.totalorder %s700_s24, %s3330_s19  ;;  %p3338_p0 = scmp.lt.s32.totalorder %s700_s24, %s700_s24 }
  0x49   : > { %p3339_p2 = scmp.lt.s32.totalorder %s3330_s19, %s3330_s19 }
  0x4a   : > { %p3333_p12 = pnand %p3331_p11, %p3804_p7 }
  0x4b   : > { %3045 = dma.hbm_to_vmem [thread:$0]  (!%p3794_p6), %s4436_s8, 64, %s668_s4, [#allocation13], %s4405_s5, %s4405_s5, %s3613_s21  }
  0x4c   : > { %p3334_p13 = pneg %p3333_p12  ;;  %p3340_p5 = por %p3339_p2, %p3338_p0 }
  0x4e   : > { %p3341_p8 = pnand %p3340_p5, %p3334_p13 }
  0x50   : > { %3344 = shalt.err (!%p3341_p8)
}
  0x51   : > { %s4437_s12 = sld [smem:[#allocation38_spill]]  ;;  %s3356_s22 = scalar_lea.vmem %s629_s26, 16 }
  0x52   : > { %p3357_p9 = scmp.ne.s32.totalorder %s629_s26, %s3356_s22  ;;  %s3363_s19 = scalar_lea.vmem %s629_s26, 32 }
  0x53   : > { %p3364_p12 = scmp.lt.s32.totalorder %s629_s26, %s629_s26  ;;  %p3365_p13 = scmp.lt.s32.totalorder %s3363_s19, %s3356_s22 }
  0x54   : > { %p3359_p10 = pnand %p3357_p9, %p3804_p7 }
  0x55   : > { %p3366_p0 = por %p3365_p13, %p3364_p12 }
  0x56   : > { %p3360_p11 = pneg %p3359_p10 }
  0x57   : > { %3051 = dma.hbm_to_vmem [thread:$0]  (!%p3794_p6), %s4437_s12, 32, %s700_s24, [#allocation16], %s4405_s5, %s4405_s5, %s3613_s21  }
  0x58   : > { %p3367_p2 = pnand %p3366_p0, %p3360_p11 }
  0x5a   : > { %3370 = shalt.err (!%p3367_p2)
}
  0x5b   : > { %s4438_s3 = sld [smem:[#allocation32_spill]]  ;;  %s3616_s24 = smov [#allocation11]  }
  0x5c   : > { %s654_s29 = sshll.u32 %s3616_s24, 4  ;;  %s3617_s4 = smov [#allocation14]   ;;  %s655_s29 = int_to_ptr.vmem [resolvable:$true] %s654_s29 }
  0x5d   : > { %s683_s20 = sshll.u32 %s3617_s4, 4  ;;  %s3382_s5 = scalar_lea.vmem %s655_s29, 64  ;;  %s684_s20 = int_to_ptr.vmem [resolvable:$true] %s683_s20 }
  0x5e   : > { %p3383_p5 = scmp.ne.s32.totalorder %s655_s29, %s3382_s5  ;;  %p3390_p10 = scmp.lt.s32.totalorder %s655_s29, %s655_s29 }
  0x5f   : > { %p3391_p11 = scmp.lt.s32.totalorder %s3382_s5, %s3382_s5 }
  0x60   : > { %p3385_p8 = pnand %p3383_p5, %p3804_p7 }
  0x61   : > { %3036 = dma.hbm_to_vmem [thread:$0]  (!%p3794_p6), %s4438_s3, 16, %s629_s26, [#allocation7]  }
  0x62   : > { %p3386_p9 = pneg %p3385_p8  ;;  %p3392_p12 = por %p3391_p11, %p3390_p10 }
  0x64   : > { %p3393_p13 = pnand %p3392_p12, %p3386_p9 }
  0x66   : > { %3396 = shalt.err (!%p3393_p13)
}
  0x67   : > { %s4439_s22 = smov 16   ;;  %s4440_s30 = sld [smem:[#allocation35_spill]] }
  0x68   : > { %s3408_s8 = scalar_lea.vmem %s684_s20, 32  ;;  %p3416_p8 = scmp.lt.s32.totalorder %s684_s20, %s684_s20 }
  0x69   : > { %p3409_p0 = scmp.ne.s32.totalorder %s684_s20, %s3408_s8  ;;  %p3417_p10 = scmp.lt.s32.totalorder %s3408_s8, %s3408_s8 }
  0x6b   : > { %p3411_p2 = pnand %p3409_p0, %p3804_p7  ;;  %p3418_p9 = por %p3417_p10, %p3416_p8 }
  0x6d   : > { %3042 = dma.hbm_to_vmem [thread:$0]  (!%p3794_p6), %s4440_s30, 64, %s655_s29, [#allocation10], %s4439_s22, %s4439_s22, %s3613_s21  }
  0x6e   : > { %p3412_p5 = pneg %p3411_p2 }
  0x70   : > { %p3419_p11 = pnand %p3418_p9, %p3412_p5 }
  0x72   : > { %3422 = shalt.err (!%p3419_p11)
}
  0x73   : > { %s4441_s10 = sld [smem:[#allocation37_spill]]  ;;  %s3618_s24 = smov [#allocation17]  }
  0x74   : > { %s715_s29 = sshll.u32 %s3618_s24, 4  ;;  %s716_s29 = int_to_ptr.vmem [resolvable:$true] %s715_s29 }
  0x75   : > { %s3434_s4 = scalar_lea.vmem %s716_s29, 32  ;;  %p3442_p2 = scmp.lt.s32.totalorder %s716_s29, %s716_s29 }
  0x76   : > { %p3435_p12 = scmp.ne.s32.totalorder %s716_s29, %s3434_s4  ;;  %p3443_p5 = scmp.lt.s32.totalorder %s3434_s4, %s3434_s4 }
  0x78   : > { %p3437_p13 = pnand %p3435_p12, %p3804_p7  ;;  %p3444_p8 = por %p3443_p5, %p3442_p2 }
  0x79   : > { %3048 = dma.hbm_to_vmem [thread:$0]  (!%p3794_p6), %s4441_s10, 32, %s684_s20, [#allocation13], %s4439_s22, %s4439_s22, %s3613_s21  }
  0x7a   : > { %p3438_p0 = pneg %p3437_p13 }
  0x7c   : > { %p3445_p10 = pnand %p3444_p8, %p3438_p0 }
  0x7e   : > { %3448 = shalt.err (!%p3445_p10)
}
  0x7f   : > { %s4442_s14 = sld [smem:[#allocation39_spill]]  ;;  %s2667_s25 = sadd.s32 4294967294, %s3581_s2  }
  0x80   : > { %s3890_s1 = sadd.s32 1, %s3581_s2   ;;  %s106_s30 = sadd.s32 1, %s3577_s6 }
  0x81   : > { %4443 = sst [smem:[#allocation26_spill]] %s3890_s1  ;;  %s103_s19 = ssub.s32 %s3581_s2, %s3890_s1 }
  0x82   : > { %p104_p7 = scmp.eq.s32.totalorder %s103_s19, 0  ;;  %p113_p9 = scmp.ne.s32.totalorder %s3577_s6, %s3573_s28 }
  0x83   : > { %p114_p11 = scmp.eq.s32.totalorder %s3581_s2, 0  ;;  %p119_p12 = scmp.ne.s32.totalorder %s3573_s28, %s3569_s27 }
  0x84   : > { %s3901_s8 = scalar_select %p104_p7, %s3577_s6, %s106_s30  }
  0x85   : > { %3054 = dma.hbm_to_vmem [thread:$0]  (!%p3794_p6), %s4442_s14, 32, %s716_s29, [#allocation16], %s4439_s22, %s4439_s22, %s3613_s21  }
  0x86   : > { %4444 = sst [smem:[#allocation27_spill]] %s3901_s8  ;;  %p3903_p13 = por %p114_p11, %p113_p9 }
  0x87   : > { %p3909_p6 = por %p4407_p1, %p119_p12  ;;  %p589_p0 = scmp.eq.s32.totalorder %s3780_s0, 1 }
  0x88   : > { %p595_p2 = scmp.eq.s32.totalorder %s2667_s25, 1  ;;  %p3071_p5 = scmp.lt.s32.totalorder %s3581_s2, 2 }
  0x89   : > { %s4446_s21 = scalar_select %p3909_p6, 1, 0 }
  0x8a   : > { %s769_s22 = sand.u32 1, %s3577_s6   ;;  %p3916_p8 = por %p589_p0, %p113_p9 }
  0x8b   : > { %p3920_p10 = por %p595_p2, %p119_p12  ;;  %s2678_s29 = sshll.u32 %s769_s22, 3 }
  0x8c   : > { %s4447_s3 = scalar_select %p3916_p8, 1, 0 }
  0x8d   : > { %s4448_s24 = scalar_select %p3920_p10, 1, 0 }
  0x8e   : > { %s2679_s4 = sshll.u32 %s3581_s2, 7  ;;  %s4449_s19 = sld [smem:[#allocation30_spill]] }
  0x8f   : > { %s773_s25 = scalar_lea.vmem [#allocation3], %s2678_s29  ;;  %p3932_p7 = pnand %p3071_p5, %p3903_p13 }
  0x90   : > { %s780_s10 = sshll.u32 %s773_s25, 4  ;;  %s770_s14 = scalar_lea.sflag [#allocation4], %s769_s22  ;;  %s781_s10 = int_to_ptr.vmem [resolvable:$true] %s780_s10 }
  0x91   : > { %p3451_p11 = pneg %p3932_p7 }
  0x94   : > { %s3928_s30 = scalar_lea.hbm %s4449_s19, %s2679_s4  ;;  %s3454_s20 = scalar_lea.hbm %s4449_s19, 256 }
  0x95   : > { %s3449_s8 = scalar_lea.hbm %s3928_s30, 128  ;;  %p3455_p2 = scmp.lt.s32.totalorder %s3928_s30, %s4449_s19 }
  0x96   : > { %p3450_p9 = scmp.ne.s32.totalorder %s3928_s30, %s3449_s8  ;;  %p3456_p13 = scmp.lt.s32.totalorder %s3454_s20, %s3449_s8 }
  0x98   : > { %p3452_p12 = pnand %p3451_p11, %p3450_p9  ;;  %p3457_p5 = por %p3456_p13, %p3455_p2 }
  0x9a   : > { %p3453_p0 = pneg %p3452_p12 }
  0x9c   : > { %p3458_p4 = pnand %p3457_p5, %p3453_p0 }
  0x9e   : > { %3461 = shalt.err (!%p3458_p4)
}
  0x9f   : > { %s3462_s5 = scalar_lea.vmem %s781_s10, 128  ;;  %s3619_s22 = smov [#allocation3]  }
  0xa0   : > { %p3463_p1 = scmp.ne.s32.totalorder %s781_s10, %s3462_s5  ;;  %s3467_s6 = sshll.u32 %s3619_s22, 4  ;;  %s3468_s6 = int_to_ptr.vmem [resolvable:$false] %s3467_s6 }
  0xa1   : > { %s3469_s1 = scalar_lea.vmem %s3468_s6, 256  ;;  %p3470_p9 = scmp.lt.s32.totalorder %s781_s10, %s3468_s6 }
  0xa2   : > { %p3465_p10 = pnand %p3463_p1, %p3451_p11  ;;  %p3471_p12 = scmp.lt.s32.totalorder %s3469_s1, %s3462_s5 }
  0xa4   : > { %p3466_p8 = pneg %p3465_p10  ;;  %p3472_p6 = por %p3471_p12, %p3470_p9 }
  0xa6   : > { %p3473_p3 = pnand %p3472_p6, %p3466_p8 }
  0xa8   : > { %3476 = shalt.err (!%p3473_p3)
}
  0xa9   : > { %3058 = dma.hbm_to_vmem [thread:$0]  (!%p3932_p7), %s3928_s30, 128, %s781_s10, %s770_s14  }
  0xaa   : > { %p4451_p0 = scmp.ne.s32.totalorder %s4431_s7, 0 }
  0xab   : > { %s3953_s8 = sand.u32 (!%p4451_p0), 1, %s3573_s28   ;;  %p4452_p1 = scmp.ne.s32.totalorder (!%p4451_p0), %s4446_s21, 0 }
  0xac   : > { %789 = sbr.rel (%p4451_p0) target bundleno = 3872 (0xf20), region = 112  ;;  %s2681_s4 = sshll.u32 (!%p4451_p0), %s3953_s8, 3 }
  0xad   : > { %s792_s26 = scalar_lea.sflag (!%p4451_p0), [#allocation4], %s3953_s8  ;;  %s3957_s6 = scalar_lea.vmem (!%p4451_p0), [#allocation3], %s2681_s4 }
  0xb1   : > { %3544 = dma.done.wait (%p4452_p1), %s792_s26, 128  }
  0xb2   : > { %3546 = vsyncadd (%p4452_p1), %s792_s26, 4294967168  ;;  %p4453_p3 = scmp.eq.s32.totalorder %s3780_s0, 0 }
  0xb4   : > { %3548 = dma.done.wait (%p4453_p3), [#allocation7], 144   ;;  %p4454_p4 = pmov %p4453_p3 }
  0xb5   : > { %p4455_p6 = pmov %p4453_p3 }
  0xb6   : > { %3550 = vsyncadd (%p4454_p4), [#allocation7], 4294967152 }
  0xb7   : > { %3552 = dma.done.wait (%p4455_p6), [#allocation10], 128   ;;  %p4456_p8 = pmov %p4453_p3 }
  0xb8   : > { %p4457_p10 = pmov %p4453_p3 }
  0xb9   : > { %3554 = vsyncadd (%p4456_p8), [#allocation10], 4294967168 }
  0xba   : > { %3556 = dma.done.wait (%p4457_p10), [#allocation13], 96   ;;  %p4458_p7 = pmov %p4453_p3 }
  0xbb   : > { %p4459_p11 = pmov %p4453_p3 }
  0xbc   : > { %3558 = vsyncadd (%p4458_p7), [#allocation13], 4294967200 }
  0xbd   : > { %3560 = dma.done.wait (%p4459_p11), [#allocation16], 64   ;;  %p4460_p2 = pmov %p4453_p3 }
  0xbe   : > { %p907_p13 = scmp.lt.s32.totalorder %s3780_s0, 1  ;;  %s2690_s10 = sshll.u32 %s3953_s8, 4  ;;  %v3620_v1 = vmov 0.0   ;;  %vm3621_vm0 = vmmov 0   ;;  %v4010_v6 = vld [vmem:[%s4394_s17] ss:$0 sm:$0xff] }
  0xbf   : > { %3562 = vsyncadd (%p4460_p2), [#allocation16], 4294967232  ;;  %2856 = vmatprep.subr.bf16.mxu0 %v3620_v1  ;;  %2858 = vmatprep.mubr.msk.bf16.mxu0 %vm3621_vm0, %v3620_v1  ;;  %s4461_s21 = sld [smem:[#allocation28_spill]]  ;;  %v4015_v7 = vld [vmem:[%s4395_s18] ss:$0 sm:$0xff]  ;;  %v3183_v8 = vld [vmem:[#allocation6] sm:$0xff]  }
  0xc0   : > { %s908_s12 = scalar_select %p907_p13, %s3780_s0, 1  ;;  %2862 = vmatprep.subr.bf16.mxu1 %v3620_v1  ;;  %2866 = vmatprep.mubr.msk.bf16.mxu1 %vm3621_vm0, %v3620_v1  ;;  %v927_v9 = vld [vmem:[%s3957_s6] sm:$0xff]  ;;  %vm944_vm1 = vcmask 130048   ;;  %v2697_v15 = vld [vmem:[#allocation8] ss:$0 sm:$0xff]  ;;  %vm1014_vm2 = vcmask 261120  }
  0xc1   : > { %s4462_s25 = sld [smem:[#allocation29_spill]]  ;;  %2857 = vmatpush3.bf16.msra.mxu0 %v3183_v8  ;;  %v928_v10 = vpack.c.bf16 %v927_v9, %v927_v9  ;;  %v3184_v11 = vld [vmem:[%s4388_s11 + $0x8] sm:$0xff]   ;;  %v3186_v13 = vld [vmem:[%s4388_s11] sm:$0xff]   ;;  %v3188_v19 = vld [vmem:[%s4388_s11 + $0x18] sm:$0xff]   ;;  %s4078_s29 = scalar_lea.vmem [#allocation18], %s2690_s10 }
  0xc2   : > { %s2799_s14 = sshll.u32 %s908_s12, 4  ;;  %2870 = vmatprep.subr.bf16.mxu0 %v3620_v1  ;;  %v3185_v12 = vld [vmem:[%s4390_s13 + $0x8] sm:$0xff]   ;;  %2863 = vmatpush3.bf16.msra.mxu1 %v3184_v11  ;;  %v3187_v14 = vld [vmem:[%s4390_s13] sm:$0xff]   ;;  %v3189_v20 = vld [vmem:[%s4390_s13 + $0x18] sm:$0xff]   ;;  %s4086_s6 = smov 0  }
  0xc3   : > { %s3997_s26 = scalar_lea.vmem %s4400_s23, %s2799_s14  ;;  %2864 = vmatprep.subr.bf16.mxu1 %v3620_v1  ;;  %v3190_v24 = vld [vmem:[%s4388_s11 + $0x10] sm:$0xff]   ;;  %v2700_v26 = vld [vmem:[#allocation15] ss:$0 sm:$0xff]  ;;  %v2704_v27 = vld [vmem:[#allocation17] ss:$0 sm:$0xff] }
  0xc4   : > { %2859 = vmatmul.mubr.msk.bf16.vlgmr.msra.gmra.mxu0 %vm944_vm1, %v928_v10  ;;  %v3191_v25 = vld [vmem:[%s4390_s13 + $0x10] sm:$0xff]   ;;  %v2712_v40 = vld [vmem:[#allocation15 + $0x1] ss:$0 sm:$0xff]  ;;  %v2720_v41 = vld [vmem:[#allocation17 + $0x1] ss:$0 sm:$0xff] }
  0xc5   : > { %s911_s30 = scalar_lea.vmem %s4461_s21, %s2799_s14  ;;  %2871 = vmatpush3.bf16.msra.mxu0 %v3185_v12  ;;  %2874 = vmatprep.mubr.msk.bf16.mxu0 %vm3621_vm0, %v3620_v1 }
  0xc6   : > { %v3999_v2 = vld [vmem:[%s911_s30] sm:$0xff]   ;;  %v4001_v3 = vld [vmem:[%s911_s30 + $0x8] sm:$0xff]   ;;  %2872 = vmatprep.subr.bf16.mxu0 %v3620_v1  ;;  %2865 = vmatpush3.bf16.msra.mxu1 %v3186_v13 }
  0xc7   : > { %s916_s5 = scalar_lea.vmem %s4462_s25, %s2799_s14  ;;  %2878 = vmatprep.subr.bf16.mxu1 %v3620_v1 }
  0xc8   : > { %v4003_v4 = vld [vmem:[%s916_s5] sm:$0xff]  ;;  %v4005_v5 = vld [vmem:[%s916_s5 + $0x8] sm:$0xff] }
  0xc9   : > { %2873 = vmatpush3.bf16.msra.mxu0 %v3187_v14 }
  0xca   : > { %2886 = vmatprep.subr.bf16.mxu0 %v3620_v1 }
 0x184   : > { %v982_v16 = vpop.f32.mrf.mxu0 }
 0x185   : > { %v983_v17 = vadd.f32 %v2697_v15, %v982_v16 }
 0x186   : > { %v2860_v18 = vpop.f32.mrf.mxu0 }
 0x187   : > { %v988_v21 = vpack.c.bf16 %v983_v17, %v983_v17 }
 0x188   : > { %v985_v22 = vpop.f32.mrf.mxu0 }
 0x189   : > { %2867 = vmatmul.mubr.msk.bf16.vlgmr.msra.gmra.mxu1 %vm1014_vm2, %v988_v21  ;;  %2875 = vmatmul.mubr.msk.bf16.vlgmr.msra.gmra.mxu0 %vm1014_vm2, %v988_v21 }
 0x18a   : > { %2879 = vmatpush3.bf16.msra.mxu1 %v3188_v19  ;;  %2887 = vmatpush3.bf16.msra.mxu0 %v3189_v20  ;;  %v2861_v23 = vpop.f32.mrf.mxu0 }
 0x18b   : > { %2880 = vmatprep.subr.bf16.mxu1 %v3620_v1  ;;  %2888 = vmatprep.subr.bf16.mxu0 %v3620_v1 }
 0x18c   : > { %2882 = vmatprep.mubr.msk.bf16.mxu1 %vm3621_vm0, %v3620_v1  ;;  %2890 = vmatprep.mubr.msk.bf16.mxu0 %vm3621_vm0, %v3620_v1 }
 0x18e   : > { %2881 = vmatpush3.bf16.msra.mxu1 %v3190_v24  ;;  %2889 = vmatpush3.bf16.msra.mxu0 %v3191_v25 }
 0x191   : > { %2883 = vmatmul.mubr.msk.bf16.vlgmr.msra.gmra.mxu1 %vm1014_vm2, %v988_v21  ;;  %2891 = vmatmul.mubr.msk.bf16.vlgmr.msra.gmra.mxu0 %vm1014_vm2, %v988_v21 }
 0x249   : > { %v1052_v28 = vpop.f32.mrf.mxu1  ;;  %v1116_v29 = vpop.f32.mrf.mxu0 }
 0x24a   : > { %v4060_v30 = vadd.f32 %v2700_v26, %v1052_v28  ;;  %v4062_v31 = vadd.f32 %v2704_v27, %v1116_v29 }
 0x24b   : > { %v2868_v32 = vpop.f32.mrf.mxu1  ;;  %v2876_v33 = vpop.f32.mrf.mxu0 }
 0x24c   : > { %v1058_v34 = vpack.c.bf16 %v4060_v30, %v4060_v30  ;;  %v1122_v35 = vpack.c.bf16 %v4062_v31, %v4062_v31 }
 0x24d   : > { %v1055_v36 = vpop.f32.mrf.mxu1  ;;  %v1119_v37 = vpop.f32.mrf.mxu0 }
 0x24f   : > { %v2869_v38 = vpop.f32.mrf.mxu1  ;;  %v2877_v39 = vpop.f32.mrf.mxu0 }
 0x251   : > { %v1182_v42 = vpop.f32.mrf.mxu1  ;;  %v1248_v43 = vpop.f32.mrf.mxu0 }
 0x252   : > { %v4068_v44 = vadd.f32 %v2712_v40, %v1182_v42  ;;  %v4070_v45 = vadd.f32 %v2720_v41, %v1248_v43 }
 0x253   : > { %v2884_v46 = vpop.f32.mrf.mxu1  ;;  %v2892_v47 = vpop.f32.mrf.mxu0 }
 0x254   : > { %v1188_v48 = vpack.c.bf16 %v4068_v44, %v4068_v44  ;;  %v1254_v49 = vpack.c.bf16 %v4070_v45, %v4070_v45 }
 0x255   : > { %v1185_v50 = vpop.f32.mrf.mxu1  ;;  %v1251_v51 = vpop.f32.mrf.mxu0 }
 0x257   : > { %v2885_v52 = vpop.f32.mrf.mxu1  ;;  %v2893_v53 = vpop.f32.mrf.mxu0 }
 0x258 LB: >> { %s4097_s10 = smov 0   ;;  %s3593_s6 = sphi %s4086_s6, %s1260_s6   ;;  %v3589_v2 = vphi %v3999_v2, %v4469_v2   ;;  %v3585_v3 = vphi %v4001_v3, %v4468_v3  }
 0x259 LB: >>> { %s2724_s25 = sshll.u32 %s3593_s6, 1  ;;  %v3622_v54 = vmov 0   ;;  %v3623_v55 = vmov 0.0   ;;  %s4463_s7 = sld [smem:[#allocation33_spill]]  ;;  %vm3624_vm3 = vmmov 0   ;;  %vm1290_vm4 = vcmask 1040384   ;;  %s3605_s10 = sphi %s4097_s10, %s1268_s10   ;;  %v3601_v2 = vphi %v3589_v2, %v4467_v2   ;;  %v3597_v3 = vphi %v3585_v3, %v4466_v3  }
 0x25a   : >>> { %3192 = vset.pattern.permute.xlu0 %v3622_v54  ;;  %2894 = vmatprep.subr.bf16.mxu0 %v3623_v55  ;;  %s4111_s5 = sadd.s32 %s3605_s10, %s2724_s25  ;;  %vm1426_vm5 = vcmask 1046528   ;;  %s1268_s10 = sadd.s32 1, %s3605_s10  }
 0x25b   : >>> { %1275 = vperm.xlu0 %3192, %v4003_v4   ;;  %2902 = vmatprep.subr.bf16.mxu1 %v3623_v55  ;;  %s2802_s22 = smul.u32 48, %s4111_s5  ;;  %s1286_s21 = scalar_lea.vmem [#allocation9], %s4111_s5 }
 0x25c   : >>> { %2898 = vmatprep.mubr.msk.bf16.mxu0 %vm3624_vm3, %v3623_v55  ;;  %2906 = vmatprep.mubr.msk.bf16.mxu1 %vm3624_vm3, %v3623_v55  ;;  %v2748_v29 = vld [vmem:[%s1286_s21] ss:$0 sm:$0xff]  ;;  %s1508_s14 = scalar_lea.vmem [#allocation11], %s4111_s5  ;;  %s1510_s30 = scalar_lea.vmem [#allocation12], %s4111_s5 }
 0x25d   : >>> { %p1265_p5 = scmp.ge.s32.totalorder %s1268_s10, 2  }
 0x25e   : >> { %vm3626_vm6 = vmmov (%p1265_p5), 0   ;;  %vm1677_vm7 = vcmask (%p1265_p5), 64512   ;;  %vm1704_vm8 = vcmask (%p1265_p5), 1043456   ;;  %s1260_s6 = sadd.s32 (%p1265_p5), 1, %s3593_s6  }
 0x25f   : >>> { %s4117_s1 = scalar_lea.vmem %s4463_s7, %s2802_s22  ;;  %1280 = vperm.xlu0 %3192, %v4005_v5   ;;  %p1257_p9 = scmp.ge.s32.totalorder (%p1265_p5), %s1260_s6, 2  }
 0x260   : >>> { %v3193_v56 = vld [vmem:[%s4117_s1 + $0x18] sm:$0xff]   ;;  %v3194_v57 = vld [vmem:[%s4117_s1 + $0x10] sm:$0xff]   ;;  %v3195_v58 = vld [vmem:[%s4117_s1 + $0x8] sm:$0xff]  }
 0x261   : >>> { %2895 = vmatpush3.bf16.msra.mxu0 %v3193_v56  ;;  %2903 = vmatpush3.bf16.msra.mxu1 %v3195_v58  ;;  %v3196_v59 = vld [vmem:[%s4117_s1] sm:$0xff]   ;;  %v3197_v8 = vld [vmem:[%s4117_s1 + $0x28] sm:$0xff]  }
 0x262   : >>> { %2896 = vmatprep.subr.bf16.mxu0 %v3623_v55  ;;  %2904 = vmatprep.subr.bf16.mxu1 %v3623_v55  ;;  %v3198_v16 = vld [vmem:[%s4117_s1 + $0x20] sm:$0xff]  }
 0x265   : >>> { %2897 = vmatpush3.bf16.msra.mxu0 %v3194_v57  ;;  %2905 = vmatpush3.bf16.msra.mxu1 %v3196_v59 }
 0x266   : >>> { %2910 = vmatprep.subr.bf16.mxu0 %v3623_v55 }
 0x2d6   : >>> { %v1276_v60 = vpop.permute.xlu0 %1275 }
 0x2d7   : >>> { %v1283_v61 = vmul.f32 %v3601_v2, %v1276_v60 }
 0x2d9   : >>> { %v1291_v63 = vrot.slane %v1283_v61, 7  ;;  %v1427_v14 = vrot.slane %v1283_v61, 1 }
 0x2da   : >>> { %v1281_v62 = vpop.permute.xlu0 %1280 }
 0x2db   : >>> { %v1284_v0 = vmul.f32 %v3597_v3, %v1281_v62  ;;  %v1296_v13 = vsel %vm1290_vm4, 0.0, %v1291_v63 }
 0x2dd   : >>> { %v1292_v9 = vrot.slane %v1284_v0, 7  ;;  %v1305_v10 = vpack.c.bf16 %v1284_v0, %v1283_v61  ;;  %v1428_v11 = vrot.slane %v1284_v0, 1 }
 0x2df   : >>> { %2899 = vmatmul.mubr.msk.bf16.vlgmr.msra.gmra.mxu0 %vm1014_vm2, %v1305_v10  ;;  %v1293_v12 = vsel %vm1290_vm4, %v1291_v63, %v1292_v9  ;;  %v1432_v17 = vsel %vm1426_vm5, %v1428_v11, 0.0  ;;  %v1429_v18 = vsel %vm1426_vm5, %v1427_v14, %v1428_v11  ;;  %v2749_v9 = vld [vmem:[%s1508_s14] ss:$0 sm:$0xff] }
 0x2e0   : >>> { %2911 = vmatpush3.bf16.msra.mxu0 %v3197_v8  ;;  %v1297_v15 = vpack.c.bf16 %v1293_v12, %v1296_v13  ;;  %2914 = vmatprep.mubr.msk.bf16.mxu0 %vm3624_vm3, %v3623_v55  ;;  %v1433_v19 = vpack.c.bf16 %v1432_v17, %v1429_v18  ;;  %v2750_v11 = vld [vmem:[%s1510_s30] ss:$0 sm:$0xff] }
 0x2e1   : >>> { %2912 = vmatprep.subr.bf16.mxu0 %v3623_v55 }
 0x2e2   : >>> { %2907 = vmatmul.mubr.msk.bf16.vlgmr.msra.gmra.mxu1 %vm1014_vm2, %v1297_v15 }
 0x2e4   : >>> { %2913 = vmatpush3.bf16.msra.mxu0 %v3198_v16 }
 0x2e7   : >>> { %2915 = vmatmul.mubr.msk.bf16.vlgmr.msra.gmra.mxu0 %vm1014_vm2, %v1433_v19 }
 0x39f   : >>> { %v1363_v20 = vpop.f32.mrf.mxu0 }
 0x3a1   : >>> { %v2900_v21 = vpop.f32.mrf.mxu0 }
 0x3a2   : >>> { %v1419_v22 = vpop.f32.mrf.mxu1 }
 0x3a3   : >>> { %v1366_v23 = vpop.f32.mrf.mxu0  ;;  %v1420_v26 = vadd.f32 %v1419_v22, %v1363_v20  ;;  %v3625_v22 = vmov (%p1265_p5), 0.0  }
 0x3a4   : >>> { %v2908_v24 = vpop.f32.mrf.mxu1  ;;  %2918 = vmatprep.subr.bf16.mxu0 (%p1265_p5), %v3625_v22  ;;  %2926 = vmatprep.subr.bf16.mxu1 (%p1265_p5), %v3625_v22 }
 0x3a5   : >>> { %v2901_v25 = vpop.f32.mrf.mxu0  ;;  %2922 = vmatprep.mubr.msk.bf16.mxu0 (%p1265_p5), %vm3626_vm6, %v3625_v22  ;;  %2928 = vmatprep.mubr.msk.bf16.mxu1 (%p1265_p5), %vm3626_vm6, %v3625_v22  ;;  %v1634_v24 = vsel (%p1265_p5), %vm944_vm1, %v1058_v34, 0 }
 0x3a6   : >>> { %v1422_v27 = vpop.f32.mrf.mxu1  ;;  %2927 = vmatpush3.bf16.xpose.msra.mxu1 (%p1265_p5), %v1634_v24  ;;  %v2751_v25 = vld [vmem:[#allocation14] ss:$0 sm:$0xff] (%p1265_p5) }
 0x3a7   : >>> { %v1491_v28 = vpop.f32.mrf.mxu0  ;;  %v1423_v37 = vadd.f32 %v1422_v27, %v1366_v23  ;;  %v3204_v23 = vld [vmem:[%s4386_s9] sm:$0xff] (%p1265_p5)   ;;  %2938 = vmatprep.subr.bf16.mxu1 (%p1265_p5), %v3625_v22 }
 0x3a8   : >>> { %v1498_v32 = vadd.f32 %v1491_v28, %v1420_v26  ;;  %v2909_v33 = vpop.f32.mrf.mxu1 }
 0x3a9   : >>> { %v2916_v36 = vpop.f32.mrf.mxu0 }
 0x3aa   : >>> { %v1506_v38 = vadd.f32 %v2748_v29, %v1498_v32 }
 0x3ab   : >>> { %v1494_v39 = vpop.f32.mrf.mxu0 }
 0x3ac   : >>> { %v1499_v40 = vadd.f32 %v1494_v39, %v1423_v37  ;;  %v1512_v41 = vsel %vm1014_vm2, %v1506_v38, 0.0  ;;  %v3205_v39 = vld [vmem:[%s4386_s9 + $0x18] sm:$0xff] (%p1265_p5)  }
 0x3ad   : >>> { %v2917_v42 = vpop.f32.mrf.mxu0  ;;  %1513 = vadd.xlane.f32.xlu1 %v1512_v41 }
 0x3ae   : >>> { %v1507_v43 = vadd.f32 %v2748_v29, %v1499_v40  ;;  %v3206_v40 = vld [vmem:[%s4386_s9 + $0x10] sm:$0xff] (%p1265_p5)  }
 0x3b0   : >>> { %v1515_v46 = vsel %vm1014_vm2, %v1507_v43, 0.0 }
 0x3b1   : >>> { %1516 = vadd.xlane.f32.xlu1 %v1515_v46 }
 0x436   : >>> { %v1514_v47 = vpop.xlane.xlu1 %1513 }
 0x437   : >>> { %v1519_v50 = vmul.f32 0.03125, %v1514_v47 }
 0x439   : >>> { %v1521_v51 = vsub.f32 %v1506_v38, %v1519_v50 }
 0x43a   : >>> { %v1517_v52 = vpop.xlane.xlu1 %1516 }
 0x43b   : >>> { %v1520_v53 = vmul.f32 0.03125, %v1517_v52  ;;  %v1523_v54 = vmul.f32 %v1521_v51, %v1521_v51 }
 0x43d   : >>> { %v1522_v55 = vsub.f32 %v1507_v43, %v1520_v53  ;;  %v1525_v56 = vsel %vm1014_vm2, %v1523_v54, 0.0 }
 0x43e   : >>> { %1526 = vadd.xlane.f32.xlu0 %v1525_v56 }
 0x43f   : >>> { %v1524_v57 = vmul.f32 %v1522_v55, %v1522_v55 }
 0x441   : >>> { %v1528_v58 = vsel %vm1014_vm2, %v1524_v57, 0.0 }
 0x442   : >>> { %1529 = vadd.xlane.f32.xlu1 %v1528_v58 }
 0x4c7   : >>> { %v1527_v59 = vpop.xlane.xlu0 %1526 }
 0x4c8   : >>> { %v1531_v60 = vmul.f32 0.03125, %v1527_v59 }
 0x4ca   : >>> { %v1533_v61 = vadd.f32 1e-05, %v1531_v60 }
 0x4cb   : >>> { %v1530_v62 = vpop.xlane.xlu1 %1529 }
 0x4cc   : >>> { %3199 = vrsqrt.f32 %v1533_v61  ;;  %v1532_v63 = vmul.f32 0.03125, %v1530_v62  ;;  %v2761_v61 = vld [vmem:[#allocation14 + $0x1] ss:$0 sm:$0xff] (%p1265_p5) }
 0x4ce   : >>> { %v1534_v0 = vadd.f32 1e-05, %v1532_v63 }
 0x4d0   : >>> { %3201 = vrsqrt.f32 %v1534_v0  ;;  %v1706_v0 = vsel (%p1265_p5), %vm1704_vm8, %v1122_v35, 0 }
 0x4d9   : >>> { %v3200_v8 = vpop.eup %3199 }
 0x4da   : >>> { %v1537_v10 = vmul.f32 %v3200_v8, %v1521_v51 }
 0x4dc   : >>> { %v1545_v12 = vmul.f32 %v2749_v9, %v1537_v10 }
 0x4dd   : >>> { %v3202_v13 = vpop.eup %3201 }
 0x4de   : >>> { %v1553_v14 = vadd.f32 %v2750_v11, %v1545_v12  ;;  %v1538_v15 = vmul.f32 %v3202_v13, %v1522_v55 }
 0x4e0   : >>> { %v1555_v16 = vmax.f32 %v1553_v14, 0.0  ;;  %v1546_v17 = vmul.f32 %v2749_v9, %v1538_v15 }
 0x4e2   : >>> { %v4146_v2 = vadd.f32 %v3601_v2, %v1555_v16   ;;  %v1554_v19 = vadd.f32 %v2750_v11, %v1546_v17 }
 0x4e4   : >>> { %v4464_v18 = vmov %v4146_v2  ;;  %v1556_v20 = vmax.f32 %v1554_v19, 0.0 }
 0x4e5   : >>> { %v4467_v2 = vmov %v4464_v18  ;;  %1267 = sbr.rel (!%p1265_p5) target bundleno = 601 (0x259), region = 236 }
 0x4e6   : >>> { %v4149_v3 = vadd.f32 %v3597_v3, %v1556_v20   ;;  %v3203_v2 = vld [vmem:[%s4386_s9 + $0x8] sm:$0xff] (%p1265_p5)  }
 0x4e7   : >> { %2919 = vmatpush3.bf16.msra.mxu0 (%p1265_p5), %v3203_v2 }
 0x4e8   : >>> { %v4465_v21 = vmov %v4149_v3  ;;  %2920 = vmatprep.subr.bf16.mxu0 (%p1265_p5), %v3625_v22 }
 0x4e9   : >>> { %v4466_v3 = vmov %v4465_v21 }
 0x4ea   : >> { %v1559_v3 = vpack.c.bf16 %v4465_v21, %v4464_v18  ;;  %s4470_s10 = sld [smem:[#allocation40_spill]] (%p1257_p9)  ;;  %vm2322_vm9 = vcmask (%p1257_p9), 7168   ;;  %s2422_s1 = sshll.u32 (%p1257_p9), %s4078_s29, 4  ;;  %s4331_s1 = int_to_ptr.vmem [resolvable:$true] %s2422_s1 }
 0x4eb   : >> { %2921 = vmatpush3.bf16.msra.mxu0 %v3204_v23  ;;  %s4471_s4 = sld [smem:[#allocation41_spill]] (%p1257_p9)  ;;  %s3477_s25 = scalar_lea.vmem (%p1257_p9), %s4331_s1, 256 }
 0x4ec   : >> { %2932 = vmatprep.subr.bf16.mxu0 %v3625_v22  ;;  %s4472_s7 = sld [smem:[#allocation42_spill]] (%p1257_p9)  ;;  %p3478_p12 = scmp.ne.s32.totalorder (%p1257_p9), %s4331_s1, %s3477_s25 }
 0x4ed   : > { %s4473_s30 = sld [smem:[#allocation43_spill]] (%p1257_p9)  ;;  %p4474_p0 = scmp.ne.s32.totalorder (%p1257_p9), %s4447_s3, 0 }
 0x4ee   : >> { %2923 = vmatmul.mubr.msk.bf16.vlgmr.msra.gmra.mxu0 %vm1014_vm2, %v1559_v3  ;;  %s3628_s5 = smov (%p1257_p9), [#allocation18]  }
 0x4ef   : >> { %2934 = vmatprep.mubr.msk.bf16.mxu0 %vm3626_vm6, %v3625_v22  ;;  %2933 = vmatpush3.bf16.msra.mxu0 %v1706_v0  ;;  %p3479_p1 = pnand (%p1257_p9), %p3478_p12, %p4474_p0  ;;  %s3481_s22 = sshll.u32 (%p1257_p9), %s3628_s5, 4  ;;  %s3482_s22 = int_to_ptr.vmem [resolvable:$false] %s3481_s22 }
 0x4f0   : >> { %2946 = vmatprep.subr.bf16.mxu0 %v3625_v22  ;;  %v3233_v30 = vld [vmem:[%s4470_s10 + $0x8] sm:$0xff] (%p1257_p9)   ;;  %v3234_v31 = vld [vmem:[%s4470_s10] sm:$0xff] (%p1257_p9)   ;;  %p3484_p4 = scmp.lt.s32.totalorder (%p1257_p9), %s4331_s1, %s3482_s22 }
 0x4f1   : > { %p3480_p3 = pneg (%p1257_p9), %p3479_p1 }
 0x5ae   : >> { %v1620_v26 = vpop.f32.mrf.mxu0 }
 0x5af   : >> { %v1621_v28 = vadd.f32 %v2751_v25, %v1620_v26 }
 0x5b0   : >> { %v2924_v27 = vpop.f32.mrf.mxu0 }
 0x5b1   : >> { %v1627_v36 = vmul.f32 0.25, %v1621_v28 }
 0x5b2   : >> { %v1623_v29 = vpop.f32.mrf.mxu0 }
 0x5b3   : >> { %v1624_v32 = vadd.f32 %v2751_v25, %v1623_v29 }
 0x5b4   : >> { %v2925_v33 = vpop.f32.mrf.mxu0 }
 0x5b5   : >> { %v1628_v37 = vmul.f32 0.25, %v1624_v32 }
 0x5b7   : >> { %v1629_v38 = vpack.c.bf16 %v1628_v37, %v1627_v36 }
 0x5b9   : >> { %2929 = vmatmul.mubr.msk.bf16.vlgmr.msra.gmra.mxu1 %vm944_vm1, %v1629_v38 }
 0x5ba   : >> { %2942 = vmatprep.mubr.msk.bf16.mxu1 %vm3626_vm6, %v3625_v22  ;;  %2939 = vmatpush3.bf16.msra.mxu1 %v3205_v39 }
 0x5bb   : >> { %2940 = vmatprep.subr.bf16.mxu1 %v3625_v22 }
 0x5be   : >> { %2941 = vmatpush3.bf16.msra.mxu1 %v3206_v40 }
 0x5bf   : >> { %2952 = vmatprep.subr.bf16.mxu1 %v3625_v22 }
 0x5c1   : >> { %2943 = vmatmul.mubr.msk.bf16.vlgmr.msra.gmra.mxu1 %vm1014_vm2, %v1559_v3  ;;  %v1825_v3 = vsel %vm944_vm1, %v1188_v48, 0 }
 0x5c2   : >> { %2954 = vmatprep.mubr.msk.bf16.mxu1 %vm3626_vm6, %v3625_v22 }
 0x679   : >> { %v1670_v41 = vpop.f32.mrf.mxu1 }
 0x67a   : >> { %v1678_v42 = vsel %vm1677_vm7, %v1670_v41, -inf }
 0x67b   : >> { %1679 = vmax.xlane.f32.xlu0 %v1678_v42  ;;  %v2930_v43 = vpop.f32.mrf.mxu1 }
 0x67d   : >> { %v1673_v46 = vpop.f32.mrf.mxu1 }
 0x67e   : >> { %v1681_v47 = vsel %vm1677_vm7, %v1673_v46, -inf }
 0x67f   : >> { %1682 = vmax.xlane.f32.xlu0 %v1681_v47  ;;  %v2931_v50 = vpop.f32.mrf.mxu1 }
 0x681   : >> { %v1811_v62 = vpop.f32.mrf.mxu1 }
 0x682   : >> { %v1812_v63 = vadd.f32 %v2761_v61, %v1811_v62 }
 0x683   : >> { %v2944_v8 = vpop.f32.mrf.mxu1 }
 0x684   : >> { %v1818_v10 = vmul.f32 0.25, %v1812_v63 }
 0x685   : >> { %v1814_v9 = vpop.f32.mrf.mxu1 }
 0x686   : >> { %v1815_v11 = vadd.f32 %v2761_v61, %v1814_v9  ;;  %v3207_v61 = vld [vmem:[%s4392_s15] sm:$0xff]  }
 0x687   : >> { %v2945_v12 = vpop.f32.mrf.mxu1 }
 0x688   : >> { %v1819_v13 = vmul.f32 0.25, %v1815_v11 }
 0x68a   : >> { %v1820_v14 = vpack.c.bf16 %v1819_v13, %v1818_v10 }
 0x704   : >> { %v1680_v51 = vpop.xlane.xlu0 %1679 }
 0x705   : >> { %v1684_v52 = vsub.f32 %v1670_v41, %v1680_v51 }
 0x707   : >> { %v1686_v53 = vmul.f32 1.442695, %v1684_v52 }
 0x708   : >> { %v1683_v54 = vpop.xlane.xlu0 %1682 }
 0x709   : >> { %3209 = vpow2.f32 %v1686_v53  ;;  %v1685_v55 = vsub.f32 %v1673_v46, %v1683_v54  ;;  %v1895_v53 = vsel %vm1704_vm8, %v1254_v49, 0  ;;  %v3208_v54 = vld [vmem:[%s4392_s15 + $0x8] sm:$0xff]  }
 0x70a   : >> { %2953 = vmatpush3.bf16.msra.mxu1 %v1895_v53  ;;  %v3235_v49 = vld [vmem:[%s4470_s10 + $0x28] sm:$0xff] (%p1257_p9)  }
 0x70b   : >> { %v1688_v56 = vmul.f32 1.442695, %v1685_v55  ;;  %2964 = vmatprep.subr.bf16.mxu1 %v3625_v22 }
 0x70d   : >> { %3211 = vpow2.f32 %v1688_v56 }
 0x716   : >> { %v3210_v57 = vpop.eup %3209 }
 0x717   : >> { %v1690_v58 = vsel %vm1677_vm7, %v3210_v57, 0.0 }
 0x718   : >> { %1691 = vadd.xlane.f32.xlu1 %v1690_v58 }
 0x71a   : >> { %v3212_v59 = vpop.eup %3211 }
 0x71b   : >> { %v1693_v60 = vsel %vm1677_vm7, %v3212_v59, 0.0 }
 0x71c   : >> { %1694 = vadd.xlane.f32.xlu1 %v1693_v60 }
 0x7a1   : >> { %v1692_v15 = vpop.xlane.xlu1 %1691 }
 0x7a2   : >> { %3213 = vrcp.f32 %v1692_v15 }
 0x7a5   : >> { %v1695_v16 = vpop.xlane.xlu1 %1694 }
 0x7a6   : >> { %3215 = vrcp.f32 %v1695_v16  ;;  %v2773_v16 = vld [vmem:[%s4393_s16] ss:$0 sm:$0xff] }
 0x7af   : >> { %v3214_v17 = vpop.eup %3213 }
 0x7b0   : >> { %v1698_v20 = vmul.f32 %v3214_v17, %v3210_v57 }
 0x7b3   : >> { %v3216_v19 = vpop.eup %3215 }
 0x7b4   : >> { %v1699_v2 = vmul.f32 %v3216_v19, %v3212_v59 }
 0x7b6   : >> { %v1700_v23 = vpack.c.bf16 %v1699_v2, %v1698_v20 }
 0x7b8   : >> { %2935 = vmatmul.mubr.msk.bf16.vlgmr.msra.gmra.mxu0 %vm1677_vm7, %v1700_v23 }
 0x7b9   : >> { %2947 = vmatpush3.bf16.xpose.msra.mxu0 %v1825_v3  ;;  %2948 = vmatprep.mubr.msk.bf16.mxu0 %vm3626_vm6, %v3625_v22 }
 0x7ba   : >> { %2958 = vmatprep.subr.bf16.mxu0 %v3625_v22 }
 0x7c0   : >> { %2949 = vmatmul.mubr.msk.bf16.vlgmr.msra.gmra.mxu0 %vm944_vm1, %v1820_v14 }
 0x7c1   : >> { %2960 = vmatprep.mubr.msk.bf16.mxu0 %vm3626_vm6, %v3625_v22  ;;  %2959 = vmatpush3.bf16.msra.mxu0 %v3208_v54 }
 0x7c2   : > { %2970 = vmatprep.subr.bf16.mxu0 (%p1257_p9), %v3620_v1 }
 0x878   : >> { %v1742_v24 = vpop.f32.mrf.mxu0 }
 0x87a   : >> { %v2936_v25 = vpop.f32.mrf.mxu0 }
 0x87c   : >> { %v1745_v26 = vpop.f32.mrf.mxu0 }
 0x87d   : >> { %v1749_v27 = vpack.c.bf16 %v1745_v26, %v1742_v24 }
 0x87e   : >> { %v2937_v28 = vpop.f32.mrf.mxu0 }
 0x880   : >> { %v1861_v29 = vpop.f32.mrf.mxu0 }
 0x881   : >> { %v1868_v32 = vsel %vm1677_vm7, %v1861_v29, -inf }
 0x882   : >> { %1869 = vmax.xlane.f32.xlu0 %v1868_v32  ;;  %v2950_v33 = vpop.f32.mrf.mxu0 }
 0x884   : >> { %v1864_v36 = vpop.f32.mrf.mxu0 }
 0x885   : >> { %v1871_v37 = vsel %vm1677_vm7, %v1864_v36, -inf }
 0x886   : >> { %1872 = vmax.xlane.f32.xlu1 %v1871_v37  ;;  %v2951_v38 = vpop.f32.mrf.mxu0 }
 0x90b   : >> { %v1870_v39 = vpop.xlane.xlu0 %1869 }
 0x90c   : >> { %v1874_v40 = vsub.f32 %v1861_v29, %v1870_v39 }
 0x90e   : >> { %v1876_v41 = vmul.f32 1.442695, %v1874_v40 }
 0x90f   : >> { %v1873_v42 = vpop.xlane.xlu1 %1872 }
 0x910   : >> { %3217 = vpow2.f32 %v1876_v41  ;;  %v1875_v43 = vsub.f32 %v1864_v36, %v1873_v42 }
 0x912   : >> { %v1878_v46 = vmul.f32 1.442695, %v1875_v43 }
 0x914   : >> { %3219 = vpow2.f32 %v1878_v46 }
 0x91d   : >> { %v3218_v47 = vpop.eup %3217 }
 0x91e   : >> { %v1880_v50 = vsel %vm1677_vm7, %v3218_v47, 0.0 }
 0x91f   : >> { %1881 = vadd.xlane.f32.xlu0 %v1880_v50 }
 0x921   : >> { %v3220_v51 = vpop.eup %3219 }
 0x922   : >> { %v1883_v52 = vsel %vm1677_vm7, %v3220_v51, 0.0 }
 0x923   : >> { %1884 = vadd.xlane.f32.xlu1 %v1883_v52 }
 0x9a8   : >> { %v1882_v55 = vpop.xlane.xlu0 %1881 }
 0x9a9   : >> { %3221 = vrcp.f32 %v1882_v55 }
 0x9ac   : >> { %v1885_v56 = vpop.xlane.xlu1 %1884 }
 0x9ad   : >> { %3223 = vrcp.f32 %v1885_v56 }
 0x9b6   : >> { %v3222_v57 = vpop.eup %3221 }
 0x9b7   : >> { %v1888_v59 = vmul.f32 %v3222_v57, %v3218_v47 }
 0x9ba   : >> { %v3224_v58 = vpop.eup %3223 }
 0x9bb   : >> { %v1889_v60 = vmul.f32 %v3224_v58, %v3220_v51  ;;  %v3231_v58 = vld [vmem:[%s4470_s10 + $0x18] sm:$0xff] (%p1257_p9)  }
 0x9bd   : >> { %v1890_v62 = vpack.c.bf16 %v1889_v60, %v1888_v59  ;;  %v3627_v59 = vmov (%p1257_p9), 0   ;;  %v3232_v60 = vld [vmem:[%s4470_s10 + $0x10] sm:$0xff] (%p1257_p9)  }
 0x9be   : > { %3229 = vset.pattern.permute.xlu0 (%p1257_p9), %v3627_v59  ;;  %3230 = vset.pattern.permute.xlu1 (%p1257_p9), %v3627_v59 }
 0x9bf   : >> { %2955 = vmatmul.mubr.msk.bf16.vlgmr.msra.gmra.mxu1 %vm1677_vm7, %v1890_v62 }
 0x9c0   : >> { %2965 = vmatpush3.bf16.msra.mxu1 %v3207_v61  ;;  %2966 = vmatprep.mubr.msk.bf16.mxu1 %vm3626_vm6, %v3625_v22 }
 0x9c1   : > { %2978 = vmatprep.subr.bf16.mxu1 (%p1257_p9), %v3620_v1 }
 0x9c7   : >> { %2967 = vmatmul.mubr.msk.bf16.vlgmr.msra.gmra.mxu1 %vm944_vm1, %v1749_v27 }
 0x9c8   : > { %2982 = vmatprep.mubr.msk.bf16.mxu1 (%p1257_p9), %vm3621_vm0, %v3620_v1  ;;  %2979 = vmatpush3.bf16.msra.mxu1 (%p1257_p9), %v3233_v30 }
 0x9c9   : > { %2980 = vmatprep.subr.bf16.mxu1 (%p1257_p9), %v3620_v1 }
 0x9cc   : > { %2981 = vmatpush3.bf16.msra.mxu1 (%p1257_p9), %v3234_v31 }
 0xa7f   : >> { %v1931_v63 = vpop.f32.mrf.mxu1 }
 0xa81   : >> { %v2956_v0 = vpop.f32.mrf.mxu1 }
 0xa83   : >> { %v1934_v8 = vpop.f32.mrf.mxu1 }
 0xa84   : >> { %v1938_v9 = vpack.c.bf16 %v1934_v8, %v1931_v63 }
 0xa85   : >> { %v2957_v10 = vpop.f32.mrf.mxu1 }
 0xa86   : >> { %2961 = vmatmul.mubr.msk.bf16.vlgmr.msra.gmra.mxu0 %vm944_vm1, %v1938_v9 }
 0xa87   : >> { %v2035_v11 = vpop.f32.mrf.mxu1  ;;  %2974 = vmatprep.mubr.msk.bf16.mxu0 (%p1257_p9), %vm3621_vm0, %v3620_v1  ;;  %2971 = vmatpush3.bf16.msra.mxu0 (%p1257_p9), %v3231_v58 }
 0xa88   : > { %2972 = vmatprep.subr.bf16.mxu0 (%p1257_p9), %v3620_v1 }
 0xa89   : >> { %v2968_v12 = vpop.f32.mrf.mxu1 }
 0xa8b   : >> { %v2038_v13 = vpop.f32.mrf.mxu1  ;;  %2973 = vmatpush3.bf16.msra.mxu0 (%p1257_p9), %v3232_v60 }
 0xa8c   : > { %2986 = vmatprep.subr.bf16.mxu0 (%p1257_p9), %v3620_v1 }
 0xa8d   : >> { %v2969_v14 = vpop.f32.mrf.mxu1 }
 0xb46   : >> { %v1985_v15 = vpop.f32.mrf.mxu0 }
 0xb47   : >> { %v2036_v17 = vadd.f32 %v2035_v11, %v1985_v15  ;;  %v3236_v11 = vld [vmem:[%s4470_s10 + $0x20] sm:$0xff] (%p1257_p9)  }
 0xb48   : >> { %v2962_v22 = vpop.f32.mrf.mxu0 }
 0xb49   : >> { %v2049_v19 = vadd.f32 %v2773_v16, %v2036_v17 }
 0xb4a   : >> { %v1988_v20 = vpop.f32.mrf.mxu0 }
 0xb4b   : >> { %v2039_v2 = vadd.f32 %v2038_v13, %v1988_v20  ;;  %v2051_v23 = vadd.f32 %v2049_v19, %v4464_v18 }
 0xb4c   : >> { %v2963_v3 = vpop.f32.mrf.mxu0 }
 0xb4d   : >> { %v2050_v24 = vadd.f32 %v2773_v16, %v2039_v2  ;;  %v2053_v25 = vsel %vm1014_vm2, %v2051_v23, 0.0 }
 0xb4e   : >> { %2054 = vadd.xlane.f32.xlu0 %v2053_v25 }
 0xb4f   : >> { %v2052_v26 = vadd.f32 %v2050_v24, %v4465_v21 }
 0xb51   : >> { %v2056_v27 = vsel %vm1014_vm2, %v2052_v26, 0.0 }
 0xb52   : >> { %2057 = vadd.xlane.f32.xlu1 %v2056_v27 }
 0xbd7   : >> { %v2055_v28 = vpop.xlane.xlu0 %2054 }
 0xbd8   : >> { %v2060_v29 = vmul.f32 0.03125, %v2055_v28 }
 0xbda   : >> { %v2062_v32 = vsub.f32 %v2051_v23, %v2060_v29 }
 0xbdb   : >> { %v2058_v33 = vpop.xlane.xlu1 %2057 }
 0xbdc   : >> { %v2061_v36 = vmul.f32 0.03125, %v2058_v33  ;;  %v2064_v37 = vmul.f32 %v2062_v32, %v2062_v32 }
 0xbde   : >> { %v2063_v38 = vsub.f32 %v2052_v26, %v2061_v36  ;;  %v2066_v39 = vsel %vm1014_vm2, %v2064_v37, 0.0 }
 0xbdf   : >> { %2067 = vadd.xlane.f32.xlu0 %v2066_v39  ;;  %v2792_v39 = vld [vmem:[%s4471_s4] ss:$0 sm:$0xff] (%p1257_p9)  ;;  %s3483_s4 = scalar_lea.vmem (%p1257_p9), %s3482_s22, 512 }
 0xbe0   : >> { %v2065_v18 = vmul.f32 %v2063_v38, %v2063_v38  ;;  %p3485_p6 = scmp.lt.s32.totalorder (%p1257_p9), %s3483_s4, %s3477_s25 }
 0xbe2   : >> { %v2069_v40 = vsel %vm1014_vm2, %v2065_v18, 0.0  ;;  %p3486_p8 = por (%p1257_p9), %p3485_p6, %p3484_p4 }
 0xbe3   : >> { %2070 = vadd.xlane.f32.xlu1 %v2069_v40  ;;  %v2793_v40 = vld [vmem:[%s4472_s7] ss:$0 sm:$0xff] (%p1257_p9) }
 0xbe4   : > { %p3487_p10 = pnand (%p1257_p9), %p3486_p8, %p3480_p3 }
 0xbf5   : > { %2098 = vperm.xlu0 (%p1257_p9), %3229, %v4003_v4  }
 0xbf9   : > { %2103 = vperm.xlu0 (%p1257_p9), %3229, %v4005_v5  }
 0xc68   : >> { %v2068_v41 = vpop.xlane.xlu0 %2067 }
 0xc69   : >> { %v2072_v42 = vmul.f32 0.03125, %v2068_v41 }
 0xc6b   : >> { %v2074_v21 = vadd.f32 1e-05, %v2072_v42 }
 0xc6c   : >> { %v2071_v43 = vpop.xlane.xlu1 %2070 }
 0xc6d   : >> { %3225 = vrsqrt.f32 %v2074_v21  ;;  %v2073_v46 = vmul.f32 0.03125, %v2071_v43 }
 0xc6f   : >> { %v2075_v47 = vadd.f32 1e-05, %v2073_v46 }
 0xc70   : > { %v4281_v34 = vpop.permute.xlu0 (%p1257_p9), %2098 }
 0xc71   : >> { %3227 = vrsqrt.f32 %v2075_v47 }
 0xc74   : > { %v4284_v44 = vpop.permute.xlu0 (%p1257_p9), %2103 }
 0xc7a   : >> { %v3226_v50 = vpop.eup %3225 }
 0xc7b   : >> { %v2078_v51 = vmul.f32 %v3226_v50, %v2062_v32 }
 0xc7d   : >> { %v2086_v52 = vmul.f32 %v4010_v6, %v2078_v51 }
 0xc7e   : >> { %v3228_v53 = vpop.eup %3227 }
 0xc7f   : >> { %v2094_v54 = vadd.f32 %v4015_v7, %v2086_v52   ;;  %v2079_v55 = vmul.f32 %v3228_v53, %v2063_v38 }
 0xc81   : >> { %v2087_v56 = vmul.f32 %v4010_v6, %v2079_v55  ;;  %v4469_v2 = vmov %v2094_v54  ;;  %1259 = sbr.rel (!%p1257_p9) target bundleno = 600 (0x258), region = 247  ;;  %v2106_v35 = vmul.f32 (%p1257_p9), %v4281_v34, %v2094_v54 }
 0xc83   : >> { %v2095_v57 = vadd.f32 %v4015_v7, %v2087_v56   ;;  %v2112_v45 = vrot.slane (%p1257_p9), %v2106_v35, 7  ;;  %v2242_v9 = vrot.slane (%p1257_p9), %v2106_v35, 1 }
 0xc85   : >> { %v4468_v3 = vmov %v2095_v57  ;;  %v2107_v48 = vmul.f32 (%p1257_p9), %v4284_v44, %v2095_v57  ;;  %v2117_v8 = vsel (%p1257_p9), %vm1290_vm4, 0.0, %v2112_v45 }
 0xc86   : > { %v2791_v3 = vld [vmem:[#allocation2] ss:$0 sm:$0xff] }
 0xc87   : > { %v2113_v61 = vrot.slane %v2107_v48, 7  ;;  %v2123_v62 = vpack.c.bf16 %v2107_v48, %v2106_v35  ;;  %v2243_v63 = vrot.slane %v2107_v48, 1 }
 0xc89   : > { %2975 = vmatmul.mubr.msk.bf16.vlgmr.msra.gmra.mxu0 %vm1014_vm2, %v2123_v62  ;;  %v2114_v0 = vsel %vm1290_vm4, %v2112_v45, %v2113_v61  ;;  %v2244_v12 = vsel %vm1426_vm5, %v2242_v9, %v2243_v63  ;;  %v2247_v13 = vsel %vm1426_vm5, %v2243_v63, 0.0 }
 0xc8a   : > { %2987 = vmatpush3.bf16.msra.mxu0 %v3235_v49  ;;  %v2118_v10 = vpack.c.bf16 %v2114_v0, %v2117_v8  ;;  %2990 = vmatprep.mubr.msk.bf16.mxu0 %vm3621_vm0, %v3620_v1  ;;  %v2248_v14 = vpack.c.bf16 %v2247_v13, %v2244_v12 }
 0xc8b   : > { %2988 = vmatprep.subr.bf16.mxu0 %v3620_v1 }
 0xc8c   : > { %2983 = vmatmul.mubr.msk.bf16.vlgmr.msra.gmra.mxu1 %vm1014_vm2, %v2118_v10 }
 0xc8e   : > { %2989 = vmatpush3.bf16.msra.mxu0 %v3236_v11 }
 0xc91   : > { %2991 = vmatmul.mubr.msk.bf16.vlgmr.msra.gmra.mxu0 %vm1014_vm2, %v2248_v14 }
 0xd49   : > { %v2178_v15 = vpop.f32.mrf.mxu0 }
 0xd4b   : > { %v2976_v16 = vpop.f32.mrf.mxu0 }
 0xd4c   : > { %v2234_v17 = vpop.f32.mrf.mxu1 }
 0xd4d   : > { %v2181_v22 = vpop.f32.mrf.mxu0  ;;  %v2235_v2 = vadd.f32 %v2234_v17, %v2178_v15 }
 0xd4e   : > { %v2984_v19 = vpop.f32.mrf.mxu1 }
 0xd4f   : > { %v2977_v20 = vpop.f32.mrf.mxu0 }
 0xd50   : > { %v2237_v23 = vpop.f32.mrf.mxu1 }
 0xd51   : > { %v2303_v1 = vpop.f32.mrf.mxu0  ;;  %v2238_v27 = vadd.f32 %v2237_v23, %v2181_v22 }
 0xd52   : > { %v2310_v24 = vadd.f32 %v2303_v1, %v2235_v2  ;;  %v2985_v25 = vpop.f32.mrf.mxu1 }
 0xd53   : > { %v2992_v26 = vpop.f32.mrf.mxu0 }
 0xd54   : > { %v2318_v28 = vadd.f32 %v2791_v3, %v2310_v24 }
 0xd55   : > { %v2306_v29 = vpop.f32.mrf.mxu0 }
 0xd56   : > { %v2311_v32 = vadd.f32 %v2306_v29, %v2238_v27  ;;  %v2320_v33 = vmul.f32 %v2318_v28, %v4003_v4 }
 0xd57   : > { %v2993_v36 = vpop.f32.mrf.mxu0 }
 0xd58   : > { %v2319_v37 = vadd.f32 %v2791_v3, %v2311_v32  ;;  %2328 = vperm.xlu1 %3230, %v2320_v33   ;;  %2323 = vst.msk [vmem:[%s3997_s26] sm:$0xff] %vm2322_vm9, %v2320_v33 }
 0xd5a   : > { %v2321_v38 = vmul.f32 %v2319_v37, %v4005_v5 }
 0xd5c   : > { %2324 = vst.msk [vmem:[%s3997_s26 + $0x8] sm:$0xff] %vm2322_vm9, %v2321_v38  ;;  %2333 = vperm.xlu1 %3230, %v2321_v38   ;;  %s2803_s26 = sshll.u32 %s3780_s0, 8  ;;  %s2406_s0 = scalar_lea.sflag [#allocation5], %s3953_s8 }
 0xd5d   : > { %s4329_s20 = scalar_lea.hbm %s4473_s30, %s2803_s26 }
 0xdd3   : > { %v2329_v18 = vpop.permute.xlu1 %2328 }
 0xdd4   : > { %v2342_v41 = vmul.f32 %v2792_v39, %v2329_v18 }
 0xdd6   : > { %v2351_v42 = vadd.f32 %v2793_v40, %v2342_v41 }
 0xdd7   : > { %v2334_v4 = vpop.permute.xlu1 %2333 }
 0xdd8   : > { %v2343_v21 = vmul.f32 %v2792_v39, %v2334_v4  ;;  %v2353_v43 = vsel %vm1014_vm2, %v2351_v42, 0.0 }
 0xdd9   : > { %2354 = vadd.xlane.f32.xlu0 %v2353_v43 }
 0xdda   : > { %v2352_v46 = vadd.f32 %v2793_v40, %v2343_v21 }
 0xddc   : > { %v2356_v5 = vsel %vm1014_vm2, %v2352_v46, 0.0 }
 0xddd   : > { %2357 = vadd.xlane.f32.xlu1 %v2356_v5 }
 0xe62   : > { %v2355_v47 = vpop.xlane.xlu0 %2354 }
 0xe63   : > { %v2360_v50 = vmul.f32 0.03125, %v2355_v47 }
 0xe65   : > { %v2362_v51 = vsub.f32 %v2351_v42, %v2360_v50 }
 0xe66   : > { %v2358_v52 = vpop.xlane.xlu1 %2357 }
 0xe67   : > { %v2361_v53 = vmul.f32 0.03125, %v2358_v52  ;;  %v2364_v54 = vmul.f32 %v2362_v51, %v2362_v51 }
 0xe69   : > { %v2363_v55 = vsub.f32 %v2352_v46, %v2361_v53  ;;  %v2366_v56 = vsel %vm1014_vm2, %v2364_v54, 0.0 }
 0xe6a   : > { %2367 = vadd.xlane.f32.xlu0 %v2366_v56 }
 0xe6b   : > { %v2365_v57 = vmul.f32 %v2363_v55, %v2363_v55 }
 0xe6d   : > { %v2369_v58 = vsel %vm1014_vm2, %v2365_v57, 0.0 }
 0xe6e   : > { %2370 = vadd.xlane.f32.xlu0 %v2369_v58 }
 0xef3   : > { %v2368_v59 = vpop.xlane.xlu0 %2367 }
 0xef4   : > { %v2372_v60 = vmul.f32 0.03125, %v2368_v59 }
 0xef6   : > { %v2374_v30 = vadd.f32 1e-05, %v2372_v60 }
 0xef7   : > { %v2371_v31 = vpop.xlane.xlu0 %2370 }
 0xef8   : > { %3237 = vrsqrt.f32 %v2374_v30  ;;  %v2373_v35 = vmul.f32 0.03125, %v2371_v31 }
 0xefa   : > { %v2375_v45 = vadd.f32 1e-05, %v2373_v35 }
 0xefc   : > { %3239 = vrsqrt.f32 %v2375_v45 }
 0xf05   : > { %v3238_v48 = vpop.eup %3237 }
 0xf06   : > { %v2378_v49 = vmul.f32 %v3238_v48, %v2362_v51 }
 0xf08   : > { %v2386_v61 = vmul.f32 %v4010_v6, %v2378_v49 }
 0xf09   : > { %v3240_v62 = vpop.eup %3239 }
 0xf0a   : > { %v2379_v63 = vmul.f32 %v3240_v62, %v2363_v55  ;;  %v2394_v0 = vadd.f32 %v4015_v7, %v2386_v61 }
 0xf0c   : > { %v2387_v8 = vmul.f32 %v4010_v6, %v2379_v63  ;;  %v2396_v9 = vmul.f32 %v2394_v0, %v4281_v34 }
 0xf0e   : > { %v2395_v10 = vadd.f32 %v4015_v7, %v2387_v8  ;;  %2398 = vst.msk [vmem:[%s4078_s29] sm:$0xff] %vm1014_vm2, %v2396_v9 }
 0xf10   : > { %v2397_v6 = vmul.f32 %v2395_v10, %v4284_v44 }
 0xf12   : > { %2399 = vst.msk [vmem:[%s4078_s29 + $0x8] sm:$0xff] %vm1014_vm2, %v2397_v6 }
 0xf13   : > { %3490 = shalt.err (!%p3487_p10)
}
 0xf14   : > { %s3491_s29 = scalar_lea.hbm %s4329_s20, 256  ;;  %s3495_s7 = scalar_lea.hbm %s4473_s30, 512 }
 0xf15   : > { %p3492_p7 = scmp.ne.s32.totalorder %s4329_s20, %s3491_s29  ;;  %p3496_p13 = scmp.lt.s32.totalorder %s4329_s20, %s4473_s30 }
 0xf16   : > { %p3497_p5 = scmp.lt.s32.totalorder %s3495_s7, %s3491_s29 }
 0xf17   : > { %p3493_p11 = pnand %p3492_p7, %p4474_p0 }
 0xf18   : > { %p3498_p9 = por %p3497_p5, %p3496_p13 }
 0xf19   : > { %p3494_p2 = pneg %p3493_p11 }
 0xf1b   : > { %p3499_p12 = pnand %p3498_p9, %p3494_p2 }
 0xf1d   : > { %3502 = shalt.err (!%p3499_p12)
}
 0xf1e   : > { %s3629_s14 = smov 128   ;;  %s3630_s25 = smov 8  }
 0xf1f   : > { %3028 = dma.vmem_to_hbm [thread:$0]  (%p4474_p0), %s4331_s1, 256, %s4329_s20, %s2406_s0, %s3629_s14, %s3629_s14, %s3630_s25  }
 0xf20 PF: > { %s2445_s5 = sand.u32 1, %s3569_s27   ;;  %p4475_p1 = scmp.ne.s32.totalorder %s4448_s24, 0 }
 0xf21   : > { %p4476_p3 = scmp.ge.s32.totalorder %s3581_s2, 2  ;;  %s2446_s22 = scalar_lea.sflag [#allocation5], %s2445_s5 }
 0xf23   : > { %p3060_p4 = pnand %p4476_p3, %p4475_p1 }
 0xf25   : > { %p3061_p6 = pneg %p3060_p4 }
 0xf27   : > { %3564 = dma.done.wait (%p3061_p6), %s2446_s22, 256  }
 0xf28   : > { %3566 = vsyncadd (%p3061_p6), %s2446_s22, 4294967040  ;;  %s4477_s2 = sld [smem:[#allocation26_spill]]  ;;  %s4480_s27 = smov %s3573_s28 }
 0xf29   : > { %s4478_s4 = sld [smem:[#allocation25_spill]] }
 0xf2a   : > { %s4479_s6 = sld [smem:[#allocation27_spill]] }
 0xf2e   : > { %p44_p8 = scmp.ge.s32.totalorder %s4477_s2, 4  }
 0xf2f   : > { %s4481_s28 = smov %s4478_s4 }
 0xf30   :  { %46 = sbr.rel (!%p44_p8) target bundleno = 26 (0x1a), region = 258 }
 0xf35   :  { %2451 = vsyncpa [#allocation4], 1 }
 0xf36   :  { %2453 = vsyncpa [#allocation4 + $0x1], 1 }
 0xf37   :  { %2454 = vsyncpa [#allocation7], 1 }
 0xf38   :  { %2455 = vsyncpa [#allocation10], 1 }
 0xf39   :  { %2456 = vsyncpa [#allocation13], 1 }
 0xf3a   :  { %2457 = vsyncpa [#allocation16], 1 }
 0xf3b   :  { %2458 = vsyncpa [#allocation5], 1 }
 0xf3c   :  { %2460 = vsyncpa [#allocation5 + $0x1], 1 }

</bundles_post_ra>
